<compile_context>
chip_gen: v6e
topology: v6e:2x2x1
jax: 0.10.0
libtpu: 0.0.40
codegen_flags: <defaults>
</compile_context>

<pallas_src>
import jax
import jax.numpy as jnp
from jax.experimental import pallas as pl
from jax.experimental.pallas import tpu as pltpu

COMPUTE_DTYPE = jnp.bfloat16   # MXU-native on v5e/v6e/v7x; f32 accumulation.


def _round_up(x, m):
    return (x + m - 1) // m * m


# ------------------------------ Pallas kernel -------------------------------

def _make_gather_matmul_kernel(col_blocks, q_rows):
    """Kernel factory.

    col_blocks: static tuple of (view_index, row_shift, width).  The kernel
    assembles the patch tile  patch[:, c0:c0+width] = view[shift:shift+Q, :]
    (in-kernel im2col), runs a single MXU matmul against the resident weight
    matrix, adds the bias and stores the output block.
    """
    def kernel(*refs):
        *view_refs, w_ref, b_ref, o_ref, patch_ref = refs
        c0 = 0
        for vi, shift, width in col_blocks:
            patch_ref[:, c0:c0 + width] = view_refs[vi][shift:shift + q_rows, :]
            c0 += width
        acc = jnp.dot(patch_ref[...], w_ref[...],
                      preferred_element_type=jnp.float32)
        o_ref[...] = (acc + b_ref[...]).astype(o_ref.dtype)

    return kernel


def _gather_matmul(views, col_blocks, w_mat, bias, *, grid, q_rows, out_dtype):
    """Run the gather-matmul kernel over grid = (N, D_out).

    views      : list of (array[N, DA, rows, cols] (bf16), index_map(n, d)).
    col_blocks : list of (view_index, row_shift, width) — patch column layout.
    w_mat      : [sum(widths), Cout] weights; bias: [Cout].
    """
    n_grid, d_grid = grid
    ktot, cout = w_mat.shape

    in_specs, args = [], []
    block_bytes = 0
    bytes_accessed = 0
    for arr, imap in views:
        rows, cols = arr.shape[2], arr.shape[3]
        in_specs.append(pl.BlockSpec((None, None, rows, cols), imap))
        args.append(arr)
        block_bytes += rows * cols * arr.dtype.itemsize
        bytes_accessed += n_grid * d_grid * rows * cols * arr.dtype.itemsize

    w_c = w_mat.astype(COMPUTE_DTYPE)
    b_c = bias.reshape(1, cout).astype(jnp.float32)
    in_specs += [
        pl.BlockSpec((ktot, cout), lambda n, d: (0, 0)),
        pl.BlockSpec((1, cout), lambda n, d: (0, 0)),
    ]
    args += [w_c, b_c]

    out_bytes = q_rows * cout * jnp.dtype(out_dtype).itemsize
    patch_bytes = q_rows * ktot * jnp.dtype(COMPUTE_DTYPE).itemsize
    block_bytes += w_c.size * 2 + b_c.size * 4 + out_bytes

    # Double-buffered blocks + patch scratch + headroom; stays within v7x's
    # 64 MiB physical VMEM while leaving the compiler internal scratch room.
    vmem_bytes = int(min(64 * 2 ** 20,
                         max(16 * 2 ** 20, 3 * block_bytes + 2 * patch_bytes)))

    flops = 2 * n_grid * d_grid * q_rows * ktot * cout
    bytes_accessed += (w_c.size * 2 + b_c.size * 4
                       + n_grid * d_grid * out_bytes)

    return pl.pallas_call(
        _make_gather_matmul_kernel(tuple(col_blocks), q_rows),
        out_shape=jax.ShapeDtypeStruct((n_grid, d_grid, q_rows, cout),
                                       out_dtype),
        grid_spec=pltpu.PrefetchScalarGridSpec(
            num_scalar_prefetch=0,
            grid=grid,
            in_specs=in_specs,
            out_specs=pl.BlockSpec((None, None, q_rows, cout),
                                   lambda n, d: (n, d, 0, 0)),
            scratch_shapes=[pltpu.VMEM((q_rows, ktot), COMPUTE_DTYPE)],
        ),
        compiler_params=pltpu.CompilerParams(
            dimension_semantics=("parallel", "parallel"),
            vmem_limit_bytes=vmem_bytes,
        ),
        cost_estimate=pl.CostEstimate(flops=int(flops), transcendentals=0,
                                      bytes_accessed=int(bytes_accessed)),
    )(*args)


# ------------------------------ conv wrappers --------------------------------

def _conv1_stride2(x_ndhwc, w1, b1):
    """3x3x3, stride 2, pad 1 conv (Cin -> Cout), bf16 output.

    Returns (out_rows, (Do, Ho, Wo)) with out_rows[N, Do, round_up(Ho*Wo,8),
    Cout]; rows [0, Ho*Wo) hold the (ho, wo) output plane row-major.
    """
    N, D, H, W, Cin = x_ndhwc.shape
    Cout = w1.shape[0]
    k, s, p = 3, 2, 1
    Do = (D + 2 * p - k) // s + 1
    Ho = (H + 2 * p - k) // s + 1
    Wo = (W + 2 * p - k) // s + 1
    Dp = D + 2 * p

    xp = jnp.pad(x_ndhwc, ((0, 0), (p, p), (p, p), (p, p), (0, 0)))
    # XLA-side gather of the 9 stride-2 (kh, kw) taps only (~2.25x the input,
    # cheap since Cin is small); the 3 kd taps are gathered in-kernel via the
    # BlockSpec index_map so no 27x patch matrix ever reaches HBM.
    taps = [xp[:, :, kh:kh + s * (Ho - 1) + 1:s, kw:kw + s * (Wo - 1) + 1:s, :]
            for kh in range(k) for kw in range(k)]
    xg = jnp.concatenate(taps, axis=-1)              # [N, Dp, Ho, Wo, 9*Cin]
    M = Ho * Wo
    Mp = _round_up(M, 8)
    xg = xg.reshape(N, Dp, M, k * k * Cin)
    xg = jnp.pad(xg, ((0, 0), (0, 0), (0, Mp - M), (0, 0)))

    # weight columns follow the patch K-order (kd, kh, kw, cin)
    w_mat = jnp.transpose(w1, (2, 3, 4, 1, 0)).reshape(k ** 3 * Cin, Cout)

    views = [(xg, (lambda n, d, kd=kd: (n, s * d + kd, 0, 0)))
             for kd in range(k)]
    col_blocks = [(kd, 0, k * k * Cin) for kd in range(k)]

    out_rows = _gather_matmul(views, col_blocks, w_mat, b1,
                              grid=(N, Do), q_rows=Mp,
                              out_dtype=COMPUTE_DTYPE)
    return out_rows, (Do, Ho, Wo)


def _conv1_1_plus_residual(out1_rows, dims, x_ds, w11, b11, w2, b2):
    """3x3x3 stride-1 pad-1 conv over out1 with the 1x1x1 stride-2 residual
    conv folded into the K contraction (combined bias); f32 output
    [N, Do, Ho, Wo, Cout]."""
    N = out1_rows.shape[0]
    Do, Ho, Wo = dims
    Cout = w11.shape[0]
    Cin = w2.shape[1]
    k = 3
    Dp, Hp, Wp = Do + 2, Ho + 2, Wo + 2

    out1 = out1_rows[:, :, :Ho * Wo, :].reshape(N, Do, Ho, Wo, Cout)
    x1p = jnp.pad(out1, ((0, 0), (1, 1), (1, 1), (1, 1), (0, 0)))
    x1f = x1p.reshape(N, Dp, Hp * Wp, Cout)

    # "wide row" trick: output rows are q = ho*Wp + wo, so every (kh, kw) tap
    # is a constant row shift (kh*Wp + kw) of the flattened plane.  The junk
    # rows (wo >= Wo) are computed and discarded below.
    Q = Ho * Wp
    Qp = _round_up(Q, 8)
    L = _round_up(Qp + 2 * Wp + 2, 8)       # rows needed by the largest shift
    x1f = jnp.pad(x1f, ((0, 0), (0, 0), (0, L - Hp * Wp), (0, 0)))

    # residual operand re-indexed into the same wide-row layout
    xr = jnp.pad(x_ds, ((0, 0), (0, 0), (0, 0), (0, Wp - Wo), (0, 0)))
    xr = xr.reshape(N, Do, Q, Cin)
    xr = jnp.pad(xr, ((0, 0), (0, 0), (0, Qp - Q), (0, 0)))

    # combined weights/bias: K = 27*Cout main taps + Cin residual columns
    w11_mat = jnp.transpose(w11, (2, 3, 4, 1, 0)).reshape(k ** 3 * Cout, Cout)
    w2_mat = w2.reshape(Cout, Cin).T
    w_mat = jnp.concatenate([w11_mat, w2_mat], axis=0)
    bias = b11 + b2

    views = [(x1f, (lambda n, d, kd=kd: (n, d + kd, 0, 0))) for kd in range(k)]
    views.append((xr, lambda n, d: (n, d, 0, 0)))
    col_blocks = [(kd, kh * Wp + kw, Cout)
                  for kd in range(k) for kh in range(k) for kw in range(k)]
    col_blocks.append((k, 0, Cin))           # residual columns, unpadded

    out_wide = _gather_matmul(views, col_blocks, w_mat, bias,
                              grid=(N, Do), q_rows=Qp, out_dtype=jnp.float32)
    out = out_wide[:, :, :Q, :].reshape(N, Do, Ho, Wp, Cout)[:, :, :, :Wo, :]
    return out


# --------------------------- module forward pass ----------------------------

def down_residual_conv_block(x_ncdhw, params):
    x = jnp.transpose(x_ncdhw, (0, 2, 3, 4, 1)).astype(COMPUTE_DTYPE)  # NDHWC
    out1_rows, dims = _conv1_stride2(x, params["w1"], params["b1"])
    x_ds = x[:, ::2, ::2, ::2, :]      # stride-2 samples for the 1x1x1 branch
    out = _conv1_1_plus_residual(out1_rows, dims, x_ds,
                                 params["w1_1"], params["b1_1"],
                                 params["w2"], params["b2"])
    return jnp.transpose(out, (0, 4, 1, 2, 3))   # NDHWC -> NCDHW


# ------------------------------- parameters ---------------------------------

def init_params(key, cin, cout):
    ks = jax.random.split(key, 6)

    def u(k, shape, fan_in):
        bound = 1.0 / (fan_in ** 0.5)
        return jax.random.uniform(k, shape, jnp.float32, -bound, bound)

    return dict(
        w1=u(ks[0], (cout, cin, 3, 3, 3), cin * 27),
        b1=u(ks[1], (cout,), cin * 27),
        w1_1=u(ks[2], (cout, cout, 3, 3, 3), cout * 27),
        b1_1=u(ks[3], (cout,), cout * 27),
        w2=u(ks[4], (cout, cin, 1, 1, 1), cin),
        b2=u(ks[5], (cout,), cin),
    )


# ---------------------------------- main -------------------------------------

if __name__ == "__main__":
    key = jax.random.PRNGKey(0)
    kx, kp = jax.random.split(key)

    Cin, Cout = 4, 8
    x = jax.random.normal(kx, (2, Cin, 8, 8, 8), jnp.float32)  # NCDHW
    params = init_params(kp, Cin, Cout)

    fwd = jax.jit(down_residual_conv_block)
    out = jax.block_until_ready(fwd(x, params))

    # Reference: kernels compute bf16 x bf16 -> f32-accumulated matmuls with a
    # bf16 intermediate, so compare against f32 convs of bf16-rounded operands.
    def q(t):
        return t.astype(jnp.bfloat16).astype(jnp.float32)

    def ref_conv(xx, w, b, s, p):
        y = jax.lax.conv_general_dilated(
            xx, w, window_strides=(s, s, s), padding=[(p, p)] * 3,
            dimension_numbers=("NCDHW", "OIDHW", "NCDHW"),
            precision=jax.lax.Precision.HIGHEST)
        return y + b.reshape(1, -1, 1, 1, 1)

    out1_ref = q(ref_conv(q(x), q(params["w1"]), params["b1"], 2, 1))
    ref = (ref_conv(out1_ref, q(params["w1_1"]), params["b1_1"], 1, 1)
           + ref_conv(q(x), q(params["w2"]), params["b2"], 2, 0))

    assert out.shape == (2, Cout, 4, 4, 4), out.shape
    max_err = float(jnp.max(jnp.abs(out - ref)))
    assert jnp.allclose(out, ref, atol=1e-2, rtol=1e-2), max_err

    print("KERNEL_OK")
</pallas_src>

<mosaic_0001>
module attributes {stable_mosaic.version = 11 : i64} {
  func.func @kernel(%arg0: i32, %arg1: i32, %arg2: memref<1x1x16x36xbf16, #tpu.memory_space<vmem>>, %arg3: memref<1x1x16x36xbf16, #tpu.memory_space<vmem>>, %arg4: memref<1x1x16x36xbf16, #tpu.memory_space<vmem>>, %arg5: memref<108x8xbf16, #tpu.memory_space<vmem>>, %arg6: memref<1x8xf32, #tpu.memory_space<vmem>>, %arg7: memref<1x1x16x8xbf16, #tpu.memory_space<vmem>>, %arg8: memref<16x108xbf16, #tpu.memory_space<vmem>>) attributes {dimension_semantics = [#tpu.dimension_semantics<parallel>, #tpu.dimension_semantics<parallel>], iteration_bounds = array<i64: 2, 4>, scalar_prefetch = 0 : i64, scratch_operands = 1 : i64, tpu.core_type = #tpu.core_type<tc>, window_params = [{transform_indices = @transform_0, window_bounds = array<i64: 1, 1, 16, 36>}, {transform_indices = @transform_1, window_bounds = array<i64: 1, 1, 16, 36>}, {transform_indices = @transform_2, window_bounds = array<i64: 1, 1, 16, 36>}, {pipeline_mode = #tpu.pipeline_mode<synchronous>, transform_indices = @transform_3, window_bounds = array<i64: 108, 8>}, {pipeline_mode = #tpu.pipeline_mode<synchronous>, transform_indices = @transform_4, window_bounds = array<i64: 1, 8>}, {transform_indices = @transform_5, window_bounds = array<i64: 1, 1, 16, 8>}]} {
    %c0 = arith.constant 0 : index
    %c0_0 = arith.constant 0 : index
    %c0_1 = arith.constant 0 : index
    %c0_2 = arith.constant 0 : index
    %0 = vector.load %arg2[%c0, %c0_0, %c0_1, %c0_2] : memref<1x1x16x36xbf16, #tpu.memory_space<vmem>>, vector<1x1x16x36xbf16>
    %1 = vector.shape_cast %0 : vector<1x1x16x36xbf16> to vector<16x36xbf16>
    %c0_3 = arith.constant 0 : index
    %c0_4 = arith.constant 0 : index
    %2 = vector.load %arg8[%c0_3, %c0_4] : memref<16x108xbf16, #tpu.memory_space<vmem>>, vector<16x36xbf16>
    tpu.vector_store %arg8[%c0_3, %c0_4], %1 {strides = array<i32>} : memref<16x108xbf16, #tpu.memory_space<vmem>>, vector<16x36xbf16>,
    %c0_5 = arith.constant 0 : index
    %c0_6 = arith.constant 0 : index
    %c0_7 = arith.constant 0 : index
    %c0_8 = arith.constant 0 : index
    %3 = vector.load %arg3[%c0_5, %c0_6, %c0_7, %c0_8] : memref<1x1x16x36xbf16, #tpu.memory_space<vmem>>, vector<1x1x16x36xbf16>
    %4 = vector.shape_cast %3 : vector<1x1x16x36xbf16> to vector<16x36xbf16>
    %c0_9 = arith.constant 0 : index
    %c36 = arith.constant 36 : index
    %5 = vector.load %arg8[%c0_9, %c36] : memref<16x108xbf16, #tpu.memory_space<vmem>>, vector<16x36xbf16>
    tpu.vector_store %arg8[%c0_9, %c36], %4 {strides = array<i32>} : memref<16x108xbf16, #tpu.memory_space<vmem>>, vector<16x36xbf16>,
    %c0_10 = arith.constant 0 : index
    %c0_11 = arith.constant 0 : index
    %c0_12 = arith.constant 0 : index
    %c0_13 = arith.constant 0 : index
    %6 = vector.load %arg4[%c0_10, %c0_11, %c0_12, %c0_13] : memref<1x1x16x36xbf16, #tpu.memory_space<vmem>>, vector<1x1x16x36xbf16>
    %7 = vector.shape_cast %6 : vector<1x1x16x36xbf16> to vector<16x36xbf16>
    %c0_14 = arith.constant 0 : index
    %c72 = arith.constant 72 : index
    %8 = vector.load %arg8[%c0_14, %c72] : memref<16x108xbf16, #tpu.memory_space<vmem>>, vector<16x36xbf16>
    tpu.vector_store %arg8[%c0_14, %c72], %7 {strides = array<i32>} : memref<16x108xbf16, #tpu.memory_space<vmem>>, vector<16x36xbf16>,
    %c0_15 = arith.constant 0 : index
    %c0_16 = arith.constant 0 : index
    %9 = vector.load %arg8[%c0_15, %c0_16] : memref<16x108xbf16, #tpu.memory_space<vmem>>, vector<16x108xbf16>
    %c0_17 = arith.constant 0 : index
    %c0_18 = arith.constant 0 : index
    %10 = vector.load %arg5[%c0_17, %c0_18] : memref<108x8xbf16, #tpu.memory_space<vmem>>, vector<108x8xbf16>
    %cst = arith.constant dense<0.000000e+00> : vector<16x8xf32>
    %11 = tpu.matmul %9, %10, %cst {dimension_numbers = #tpu.dot_dimension_numbers<[1], [0], [0], [1], [0, 0, 1, 1], [], []>} : vector<16x108xbf16>, vector<108x8xbf16>, vector<16x8xf32> -> vector<16x8xf32>
    %c0_19 = arith.constant 0 : index
    %c0_20 = arith.constant 0 : index
    %12 = vector.load %arg6[%c0_19, %c0_20] : memref<1x8xf32, #tpu.memory_space<vmem>>, vector<1x8xf32>
    %13 = vector.broadcast %12 : vector<1x8xf32> to vector<16x8xf32>
    %14 = arith.addf %11, %13 : vector<16x8xf32>
    %15 = arith.truncf %14 : vector<16x8xf32> to vector<16x8xbf16>
    %c0_21 = arith.constant 0 : index
    %c0_22 = arith.constant 0 : index
    %c0_23 = arith.constant 0 : index
    %c0_24 = arith.constant 0 : index
    %16 = vector.load %arg7[%c0_21, %c0_22, %c0_23, %c0_24] : memref<1x1x16x8xbf16, #tpu.memory_space<vmem>>, vector<1x1x16x8xbf16>
    %17 = vector.shape_cast %16 : vector<1x1x16x8xbf16> to vector<16x8xbf16>
    %18 = vector.shape_cast %15 : vector<16x8xbf16> to vector<1x1x16x8xbf16>
    tpu.vector_store %arg7[%c0_21, %c0_22, %c0_23, %c0_24], %18 {strides = array<i32>} : memref<1x1x16x8xbf16, #tpu.memory_space<vmem>>, vector<1x1x16x8xbf16>,
    return
  }
  func.func @transform_0(%arg0: i32, %arg1: i32) -> (i32, i32, i32, i32) {
    %c2_i32 = arith.constant 2 : i32
    %0 = arith.muli %c2_i32, %arg1 : i32
    %c0_i32 = arith.constant 0 : i32
    %1 = arith.addi %0, %c0_i32 : i32
    %c0_i32_0 = arith.constant 0 : i32
    %c0_i32_1 = arith.constant 0 : i32
    %c0_i32_2 = arith.constant 0 : i32
    return %arg0, %1, %c0_i32_0, %c0_i32_1 : i32, i32, i32, i32
  }
  func.func @transform_1(%arg0: i32, %arg1: i32) -> (i32, i32, i32, i32) {
    %c2_i32 = arith.constant 2 : i32
    %0 = arith.muli %c2_i32, %arg1 : i32
    %c1_i32 = arith.constant 1 : i32
    %1 = arith.addi %0, %c1_i32 : i32
    %c0_i32 = arith.constant 0 : i32
    %c0_i32_0 = arith.constant 0 : i32
    %c0_i32_1 = arith.constant 0 : i32
    return %arg0, %1, %c0_i32, %c0_i32_0 : i32, i32, i32, i32
  }
  func.func @transform_2(%arg0: i32, %arg1: i32) -> (i32, i32, i32, i32) {
    %c2_i32 = arith.constant 2 : i32
    %0 = arith.muli %c2_i32, %arg1 : i32
    %c2_i32_0 = arith.constant 2 : i32
    %1 = arith.addi %0, %c2_i32_0 : i32
    %c0_i32 = arith.constant 0 : i32
    %c0_i32_1 = arith.constant 0 : i32
    %c0_i32_2 = arith.constant 0 : i32
    return %arg0, %1, %c0_i32, %c0_i32_1 : i32, i32, i32, i32
  }
  func.func @transform_3(%arg0: i32, %arg1: i32) -> (i32, i32) {
    %c0_i32 = arith.constant 0 : i32
    %c0_i32_0 = arith.constant 0 : i32
    %c0_i32_1 = arith.constant 0 : i32
    return %c0_i32, %c0_i32_0 : i32, i32
  }
  func.func @transform_4(%arg0: i32, %arg1: i32) -> (i32, i32) {
    %c0_i32 = arith.constant 0 : i32
    %c0_i32_0 = arith.constant 0 : i32
    %c0_i32_1 = arith.constant 0 : i32
    return %c0_i32, %c0_i32_0 : i32, i32
  }
  func.func @transform_5(%arg0: i32, %arg1: i32) -> (i32, i32, i32, i32) {
    %c0_i32 = arith.constant 0 : i32
    %c0_i32_0 = arith.constant 0 : i32
    %c0_i32_1 = arith.constant 0 : i32
    return %arg0, %arg1, %c0_i32, %c0_i32_0 : i32, i32, i32, i32
  }
}

module attributes {stable_mosaic.version = 11 : i64} {
  func.func @kernel(%arg0: i32, %arg1: i32, %arg2: memref<1x1x40x8xbf16, #tpu.memory_space<vmem>>, %arg3: memref<1x1x40x8xbf16, #tpu.memory_space<vmem>>, %arg4: memref<1x1x40x8xbf16, #tpu.memory_space<vmem>>, %arg5: memref<1x1x24x4xbf16, #tpu.memory_space<vmem>>, %arg6: memref<220x8xbf16, #tpu.memory_space<vmem>>, %arg7: memref<1x8xf32, #tpu.memory_space<vmem>>, %arg8: memref<1x1x24x8xf32, #tpu.memory_space<vmem>>, %arg9: memref<24x220xbf16, #tpu.memory_space<vmem>>) attributes {dimension_semantics = [#tpu.dimension_semantics<parallel>, #tpu.dimension_semantics<parallel>], iteration_bounds = array<i64: 2, 4>, scalar_prefetch = 0 : i64, scratch_operands = 1 : i64, tpu.core_type = #tpu.core_type<tc>, window_params = [{transform_indices = @transform_0, window_bounds = array<i64: 1, 1, 40, 8>}, {transform_indices = @transform_1, window_bounds = array<i64: 1, 1, 40, 8>}, {transform_indices = @transform_2, window_bounds = array<i64: 1, 1, 40, 8>}, {transform_indices = @transform_3, window_bounds = array<i64: 1, 1, 24, 4>}, {pipeline_mode = #tpu.pipeline_mode<synchronous>, transform_indices = @transform_4, window_bounds = array<i64: 220, 8>}, {pipeline_mode = #tpu.pipeline_mode<synchronous>, transform_indices = @transform_5, window_bounds = array<i64: 1, 8>}, {transform_indices = @transform_6, window_bounds = array<i64: 1, 1, 24, 8>}]} {
    %c0 = arith.constant 0 : index
    %c0_0 = arith.constant 0 : index
    %c0_1 = arith.constant 0 : index
    %c0_2 = arith.constant 0 : index
    %0 = vector.load %arg2[%c0, %c0_0, %c0_1, %c0_2] : memref<1x1x40x8xbf16, #tpu.memory_space<vmem>>, vector<1x1x24x8xbf16>
    %1 = vector.shape_cast %0 : vector<1x1x24x8xbf16> to vector<24x8xbf16>
    %c0_3 = arith.constant 0 : index
    %c0_4 = arith.constant 0 : index
    %2 = vector.load %arg9[%c0_3, %c0_4] : memref<24x220xbf16, #tpu.memory_space<vmem>>, vector<24x8xbf16>
    tpu.vector_store %arg9[%c0_3, %c0_4], %1 {strides = array<i32>} : memref<24x220xbf16, #tpu.memory_space<vmem>>, vector<24x8xbf16>,
    %c0_5 = arith.constant 0 : index
    %c0_6 = arith.constant 0 : index
    %c1 = arith.constant 1 : index
    %c0_7 = arith.constant 0 : index
    %3 = vector.load %arg2[%c0_5, %c0_6, %c1, %c0_7] : memref<1x1x40x8xbf16, #tpu.memory_space<vmem>>, vector<1x1x24x8xbf16>
    %4 = vector.shape_cast %3 : vector<1x1x24x8xbf16> to vector<24x8xbf16>
    %c0_8 = arith.constant 0 : index
    %c8 = arith.constant 8 : index
    %5 = vector.load %arg9[%c0_8, %c8] : memref<24x220xbf16, #tpu.memory_space<vmem>>, vector<24x8xbf16>
    tpu.vector_store %arg9[%c0_8, %c8], %4 {strides = array<i32>} : memref<24x220xbf16, #tpu.memory_space<vmem>>, vector<24x8xbf16>,
    %c0_9 = arith.constant 0 : index
    %c0_10 = arith.constant 0 : index
    %c2 = arith.constant 2 : index
    %c0_11 = arith.constant 0 : index
    %6 = vector.load %arg2[%c0_9, %c0_10, %c2, %c0_11] : memref<1x1x40x8xbf16, #tpu.memory_space<vmem>>, vector<1x1x24x8xbf16>
    %7 = vector.shape_cast %6 : vector<1x1x24x8xbf16> to vector<24x8xbf16>
    %c0_12 = arith.constant 0 : index
    %c16 = arith.constant 16 : index
    %8 = vector.load %arg9[%c0_12, %c16] : memref<24x220xbf16, #tpu.memory_space<vmem>>, vector<24x8xbf16>
    tpu.vector_store %arg9[%c0_12, %c16], %7 {strides = array<i32>} : memref<24x220xbf16, #tpu.memory_space<vmem>>, vector<24x8xbf16>,
    %c0_13 = arith.constant 0 : index
    %c0_14 = arith.constant 0 : index
    %c6 = arith.constant 6 : index
    %c0_15 = arith.constant 0 : index
    %9 = vector.load %arg2[%c0_13, %c0_14, %c6, %c0_15] : memref<1x1x40x8xbf16, #tpu.memory_space<vmem>>, vector<1x1x24x8xbf16>
    %10 = vector.shape_cast %9 : vector<1x1x24x8xbf16> to vector<24x8xbf16>
    %c0_16 = arith.constant 0 : index
    %c24 = arith.constant 24 : index
    %11 = vector.load %arg9[%c0_16, %c24] : memref<24x220xbf16, #tpu.memory_space<vmem>>, vector<24x8xbf16>
    tpu.vector_store %arg9[%c0_16, %c24], %10 {strides = array<i32>} : memref<24x220xbf16, #tpu.memory_space<vmem>>, vector<24x8xbf16>,
    %c0_17 = arith.constant 0 : index
    %c0_18 = arith.constant 0 : index
    %c7 = arith.constant 7 : index
    %c0_19 = arith.constant 0 : index
    %12 = vector.load %arg2[%c0_17, %c0_18, %c7, %c0_19] : memref<1x1x40x8xbf16, #tpu.memory_space<vmem>>, vector<1x1x24x8xbf16>
    %13 = vector.shape_cast %12 : vector<1x1x24x8xbf16> to vector<24x8xbf16>
    %c0_20 = arith.constant 0 : index
    %c32 = arith.constant 32 : index
    %14 = vector.load %arg9[%c0_20, %c32] : memref<24x220xbf16, #tpu.memory_space<vmem>>, vector<24x8xbf16>
    tpu.vector_store %arg9[%c0_20, %c32], %13 {strides = array<i32>} : memref<24x220xbf16, #tpu.memory_space<vmem>>, vector<24x8xbf16>,
    %c0_21 = arith.constant 0 : index
    %c0_22 = arith.constant 0 : index
    %c8_23 = arith.constant 8 : index
    %c0_24 = arith.constant 0 : index
    %15 = vector.load %arg2[%c0_21, %c0_22, %c8_23, %c0_24] : memref<1x1x40x8xbf16, #tpu.memory_space<vmem>>, vector<1x1x24x8xbf16>
    %16 = vector.shape_cast %15 : vector<1x1x24x8xbf16> to vector<24x8xbf16>
    %c0_25 = arith.constant 0 : index
    %c40 = arith.constant 40 : index
    %17 = vector.load %arg9[%c0_25, %c40] : memref<24x220xbf16, #tpu.memory_space<vmem>>, vector<24x8xbf16>
    tpu.vector_store %arg9[%c0_25, %c40], %16 {strides = array<i32>} : memref<24x220xbf16, #tpu.memory_space<vmem>>, vector<24x8xbf16>,
    %c0_26 = arith.constant 0 : index
    %c0_27 = arith.constant 0 : index
    %c12 = arith.constant 12 : index
    %c0_28 = arith.constant 0 : index
    %18 = vector.load %arg2[%c0_26, %c0_27, %c12, %c0_28] : memref<1x1x40x8xbf16, #tpu.memory_space<vmem>>, vector<1x1x24x8xbf16>
    %19 = vector.shape_cast %18 : vector<1x1x24x8xbf16> to vector<24x8xbf16>
    %c0_29 = arith.constant 0 : index
    %c48 = arith.constant 48 : index
    %20 = vector.load %arg9[%c0_29, %c48] : memref<24x220xbf16, #tpu.memory_space<vmem>>, vector<24x8xbf16>
    tpu.vector_store %arg9[%c0_29, %c48], %19 {strides = array<i32>} : memref<24x220xbf16, #tpu.memory_space<vmem>>, vector<24x8xbf16>,
    %c0_30 = arith.constant 0 : index
    %c0_31 = arith.constant 0 : index
    %c13 = arith.constant 13 : index
    %c0_32 = arith.constant 0 : index
    %21 = vector.load %arg2[%c0_30, %c0_31, %c13, %c0_32] : memref<1x1x40x8xbf16, #tpu.memory_space<vmem>>, vector<1x1x24x8xbf16>
    %22 = vector.shape_cast %21 : vector<1x1x24x8xbf16> to vector<24x8xbf16>
    %c0_33 = arith.constant 0 : index
    %c56 = arith.constant 56 : index
    %23 = vector.load %arg9[%c0_33, %c56] : memref<24x220xbf16, #tpu.memory_space<vmem>>, vector<24x8xbf16>
    tpu.vector_store %arg9[%c0_33, %c56], %22 {strides = array<i32>} : memref<24x220xbf16, #tpu.memory_space<vmem>>, vector<24x8xbf16>,
    %c0_34 = arith.constant 0 : index
    %c0_35 = arith.constant 0 : index
    %c14 = arith.constant 14 : index
    %c0_36 = arith.constant 0 : index
    %24 = vector.load %arg2[%c0_34, %c0_35, %c14, %c0_36] : memref<1x1x40x8xbf16, #tpu.memory_space<vmem>>, vector<1x1x24x8xbf16>
    %25 = vector.shape_cast %24 : vector<1x1x24x8xbf16> to vector<24x8xbf16>
    %c0_37 = arith.constant 0 : index
    %c64 = arith.constant 64 : index
    %26 = vector.load %arg9[%c0_37, %c64] : memref<24x220xbf16, #tpu.memory_space<vmem>>, vector<24x8xbf16>
    tpu.vector_store %arg9[%c0_37, %c64], %25 {strides = array<i32>} : memref<24x220xbf16, #tpu.memory_space<vmem>>, vector<24x8xbf16>,
    %c0_38 = arith.constant 0 : index
    %c0_39 = arith.constant 0 : index
    %c0_40 = arith.constant 0 : index
    %c0_41 = arith.constant 0 : index
    %27 = vector.load %arg3[%c0_38, %c0_39, %c0_40, %c0_41] : memref<1x1x40x8xbf16, #tpu.memory_space<vmem>>, vector<1x1x24x8xbf16>
    %28 = vector.shape_cast %27 : vector<1x1x24x8xbf16> to vector<24x8xbf16>
    %c0_42 = arith.constant 0 : index
    %c72 = arith.constant 72 : index
    %29 = vector.load %arg9[%c0_42, %c72] : memref<24x220xbf16, #tpu.memory_space<vmem>>, vector<24x8xbf16>
    tpu.vector_store %arg9[%c0_42, %c72], %28 {strides = array<i32>} : memref<24x220xbf16, #tpu.memory_space<vmem>>, vector<24x8xbf16>,
    %c0_43 = arith.constant 0 : index
    %c0_44 = arith.constant 0 : index
    %c1_45 = arith.constant 1 : index
    %c0_46 = arith.constant 0 : index
    %30 = vector.load %arg3[%c0_43, %c0_44, %c1_45, %c0_46] : memref<1x1x40x8xbf16, #tpu.memory_space<vmem>>, vector<1x1x24x8xbf16>
    %31 = vector.shape_cast %30 : vector<1x1x24x8xbf16> to vector<24x8xbf16>
    %c0_47 = arith.constant 0 : index
    %c80 = arith.constant 80 : index
    %32 = vector.load %arg9[%c0_47, %c80] : memref<24x220xbf16, #tpu.memory_space<vmem>>, vector<24x8xbf16>
    tpu.vector_store %arg9[%c0_47, %c80], %31 {strides = array<i32>} : memref<24x220xbf16, #tpu.memory_space<vmem>>, vector<24x8xbf16>,
    %c0_48 = arith.constant 0 : index
    %c0_49 = arith.constant 0 : index
    %c2_50 = arith.constant 2 : index
    %c0_51 = arith.constant 0 : index
    %33 = vector.load %arg3[%c0_48, %c0_49, %c2_50, %c0_51] : memref<1x1x40x8xbf16, #tpu.memory_space<vmem>>, vector<1x1x24x8xbf16>
    %34 = vector.shape_cast %33 : vector<1x1x24x8xbf16> to vector<24x8xbf16>
    %c0_52 = arith.constant 0 : index
    %c88 = arith.constant 88 : index
    %35 = vector.load %arg9[%c0_52, %c88] : memref<24x220xbf16, #tpu.memory_space<vmem>>, vector<24x8xbf16>
    tpu.vector_store %arg9[%c0_52, %c88], %34 {strides = array<i32>} : memref<24x220xbf16, #tpu.memory_space<vmem>>, vector<24x8xbf16>,
    %c0_53 = arith.constant 0 : index
    %c0_54 = arith.constant 0 : index
    %c6_55 = arith.constant 6 : index
    %c0_56 = arith.constant 0 : index
    %36 = vector.load %arg3[%c0_53, %c0_54, %c6_55, %c0_56] : memref<1x1x40x8xbf16, #tpu.memory_space<vmem>>, vector<1x1x24x8xbf16>
    %37 = vector.shape_cast %36 : vector<1x1x24x8xbf16> to vector<24x8xbf16>
    %c0_57 = arith.constant 0 : index
    %c96 = arith.constant 96 : index
    %38 = vector.load %arg9[%c0_57, %c96] : memref<24x220xbf16, #tpu.memory_space<vmem>>, vector<24x8xbf16>
    tpu.vector_store %arg9[%c0_57, %c96], %37 {strides = array<i32>} : memref<24x220xbf16, #tpu.memory_space<vmem>>, vector<24x8xbf16>,
    %c0_58 = arith.constant 0 : index
    %c0_59 = arith.constant 0 : index
    %c7_60 = arith.constant 7 : index
    %c0_61 = arith.constant 0 : index
    %39 = vector.load %arg3[%c0_58, %c0_59, %c7_60, %c0_61] : memref<1x1x40x8xbf16, #tpu.memory_space<vmem>>, vector<1x1x24x8xbf16>
    %40 = vector.shape_cast %39 : vector<1x1x24x8xbf16> to vector<24x8xbf16>
    %c0_62 = arith.constant 0 : index
    %c104 = arith.constant 104 : index
    %41 = vector.load %arg9[%c0_62, %c104] : memref<24x220xbf16, #tpu.memory_space<vmem>>, vector<24x8xbf16>
    tpu.vector_store %arg9[%c0_62, %c104], %40 {strides = array<i32>} : memref<24x220xbf16, #tpu.memory_space<vmem>>, vector<24x8xbf16>,
    %c0_63 = arith.constant 0 : index
    %c0_64 = arith.constant 0 : index
    %c8_65 = arith.constant 8 : index
    %c0_66 = arith.constant 0 : index
    %42 = vector.load %arg3[%c0_63, %c0_64, %c8_65, %c0_66] : memref<1x1x40x8xbf16, #tpu.memory_space<vmem>>, vector<1x1x24x8xbf16>
    %43 = vector.shape_cast %42 : vector<1x1x24x8xbf16> to vector<24x8xbf16>
    %c0_67 = arith.constant 0 : index
    %c112 = arith.constant 112 : index
    %44 = vector.load %arg9[%c0_67, %c112] : memref<24x220xbf16, #tpu.memory_space<vmem>>, vector<24x8xbf16>
    tpu.vector_store %arg9[%c0_67, %c112], %43 {strides = array<i32>} : memref<24x220xbf16, #tpu.memory_space<vmem>>, vector<24x8xbf16>,
    %c0_68 = arith.constant 0 : index
    %c0_69 = arith.constant 0 : index
    %c12_70 = arith.constant 12 : index
    %c0_71 = arith.constant 0 : index
    %45 = vector.load %arg3[%c0_68, %c0_69, %c12_70, %c0_71] : memref<1x1x40x8xbf16, #tpu.memory_space<vmem>>, vector<1x1x24x8xbf16>
    %46 = vector.shape_cast %45 : vector<1x1x24x8xbf16> to vector<24x8xbf16>
    %c0_72 = arith.constant 0 : index
    %c120 = arith.constant 120 : index
    %47 = vector.load %arg9[%c0_72, %c120] : memref<24x220xbf16, #tpu.memory_space<vmem>>, vector<24x8xbf16>
    tpu.vector_store %arg9[%c0_72, %c120], %46 {strides = array<i32>} : memref<24x220xbf16, #tpu.memory_space<vmem>>, vector<24x8xbf16>,
    %c0_73 = arith.constant 0 : index
    %c0_74 = arith.constant 0 : index
    %c13_75 = arith.constant 13 : index
    %c0_76 = arith.constant 0 : index
    %48 = vector.load %arg3[%c0_73, %c0_74, %c13_75, %c0_76] : memref<1x1x40x8xbf16, #tpu.memory_space<vmem>>, vector<1x1x24x8xbf16>
    %49 = vector.shape_cast %48 : vector<1x1x24x8xbf16> to vector<24x8xbf16>
    %c0_77 = arith.constant 0 : index
    %c128 = arith.constant 128 : index
    %50 = vector.load %arg9[%c0_77, %c128] : memref<24x220xbf16, #tpu.memory_space<vmem>>, vector<24x8xbf16>
    tpu.vector_store %arg9[%c0_77, %c128], %49 {strides = array<i32>} : memref<24x220xbf16, #tpu.memory_space<vmem>>, vector<24x8xbf16>,
    %c0_78 = arith.constant 0 : index
    %c0_79 = arith.constant 0 : index
    %c14_80 = arith.constant 14 : index
    %c0_81 = arith.constant 0 : index
    %51 = vector.load %arg3[%c0_78, %c0_79, %c14_80, %c0_81] : memref<1x1x40x8xbf16, #tpu.memory_space<vmem>>, vector<1x1x24x8xbf16>
    %52 = vector.shape_cast %51 : vector<1x1x24x8xbf16> to vector<24x8xbf16>
    %c0_82 = arith.constant 0 : index
    %c136 = arith.constant 136 : index
    %53 = vector.load %arg9[%c0_82, %c136] : memref<24x220xbf16, #tpu.memory_space<vmem>>, vector<24x8xbf16>
    tpu.vector_store %arg9[%c0_82, %c136], %52 {strides = array<i32>} : memref<24x220xbf16, #tpu.memory_space<vmem>>, vector<24x8xbf16>,
    %c0_83 = arith.constant 0 : index
    %c0_84 = arith.constant 0 : index
    %c0_85 = arith.constant 0 : index
    %c0_86 = arith.constant 0 : index
    %54 = vector.load %arg4[%c0_83, %c0_84, %c0_85, %c0_86] : memref<1x1x40x8xbf16, #tpu.memory_space<vmem>>, vector<1x1x24x8xbf16>
    %55 = vector.shape_cast %54 : vector<1x1x24x8xbf16> to vector<24x8xbf16>
    %c0_87 = arith.constant 0 : index
    %c144 = arith.constant 144 : index
    %56 = vector.load %arg9[%c0_87, %c144] : memref<24x220xbf16, #tpu.memory_space<vmem>>, vector<24x8xbf16>
    tpu.vector_store %arg9[%c0_87, %c144], %55 {strides = array<i32>} : memref<24x220xbf16, #tpu.memory_space<vmem>>, vector<24x8xbf16>,
    %c0_88 = arith.constant 0 : index
    %c0_89 = arith.constant 0 : index
    %c1_90 = arith.constant 1 : index
    %c0_91 = arith.constant 0 : index
    %57 = vector.load %arg4[%c0_88, %c0_89, %c1_90, %c0_91] : memref<1x1x40x8xbf16, #tpu.memory_space<vmem>>, vector<1x1x24x8xbf16>
    %58 = vector.shape_cast %57 : vector<1x1x24x8xbf16> to vector<24x8xbf16>
    %c0_92 = arith.constant 0 : index
    %c152 = arith.constant 152 : index
    %59 = vector.load %arg9[%c0_92, %c152] : memref<24x220xbf16, #tpu.memory_space<vmem>>, vector<24x8xbf16>
    tpu.vector_store %arg9[%c0_92, %c152], %58 {strides = array<i32>} : memref<24x220xbf16, #tpu.memory_space<vmem>>, vector<24x8xbf16>,
    %c0_93 = arith.constant 0 : index
    %c0_94 = arith.constant 0 : index
    %c2_95 = arith.constant 2 : index
    %c0_96 = arith.constant 0 : index
    %60 = vector.load %arg4[%c0_93, %c0_94, %c2_95, %c0_96] : memref<1x1x40x8xbf16, #tpu.memory_space<vmem>>, vector<1x1x24x8xbf16>
    %61 = vector.shape_cast %60 : vector<1x1x24x8xbf16> to vector<24x8xbf16>
    %c0_97 = arith.constant 0 : index
    %c160 = arith.constant 160 : index
    %62 = vector.load %arg9[%c0_97, %c160] : memref<24x220xbf16, #tpu.memory_space<vmem>>, vector<24x8xbf16>
    tpu.vector_store %arg9[%c0_97, %c160], %61 {strides = array<i32>} : memref<24x220xbf16, #tpu.memory_space<vmem>>, vector<24x8xbf16>,
    %c0_98 = arith.constant 0 : index
    %c0_99 = arith.constant 0 : index
    %c6_100 = arith.constant 6 : index
    %c0_101 = arith.constant 0 : index
    %63 = vector.load %arg4[%c0_98, %c0_99, %c6_100, %c0_101] : memref<1x1x40x8xbf16, #tpu.memory_space<vmem>>, vector<1x1x24x8xbf16>
    %64 = vector.shape_cast %63 : vector<1x1x24x8xbf16> to vector<24x8xbf16>
    %c0_102 = arith.constant 0 : index
    %c168 = arith.constant 168 : index
    %65 = vector.load %arg9[%c0_102, %c168] : memref<24x220xbf16, #tpu.memory_space<vmem>>, vector<24x8xbf16>
    tpu.vector_store %arg9[%c0_102, %c168], %64 {strides = array<i32>} : memref<24x220xbf16, #tpu.memory_space<vmem>>, vector<24x8xbf16>,
    %c0_103 = arith.constant 0 : index
    %c0_104 = arith.constant 0 : index
    %c7_105 = arith.constant 7 : index
    %c0_106 = arith.constant 0 : index
    %66 = vector.load %arg4[%c0_103, %c0_104, %c7_105, %c0_106] : memref<1x1x40x8xbf16, #tpu.memory_space<vmem>>, vector<1x1x24x8xbf16>
    %67 = vector.shape_cast %66 : vector<1x1x24x8xbf16> to vector<24x8xbf16>
    %c0_107 = arith.constant 0 : index
    %c176 = arith.constant 176 : index
    %68 = vector.load %arg9[%c0_107, %c176] : memref<24x220xbf16, #tpu.memory_space<vmem>>, vector<24x8xbf16>
    tpu.vector_store %arg9[%c0_107, %c176], %67 {strides = array<i32>} : memref<24x220xbf16, #tpu.memory_space<vmem>>, vector<24x8xbf16>,
    %c0_108 = arith.constant 0 : index
    %c0_109 = arith.constant 0 : index
    %c8_110 = arith.constant 8 : index
    %c0_111 = arith.constant 0 : index
    %69 = vector.load %arg4[%c0_108, %c0_109, %c8_110, %c0_111] : memref<1x1x40x8xbf16, #tpu.memory_space<vmem>>, vector<1x1x24x8xbf16>
    %70 = vector.shape_cast %69 : vector<1x1x24x8xbf16> to vector<24x8xbf16>
    %c0_112 = arith.constant 0 : index
    %c184 = arith.constant 184 : index
    %71 = vector.load %arg9[%c0_112, %c184] : memref<24x220xbf16, #tpu.memory_space<vmem>>, vector<24x8xbf16>
    tpu.vector_store %arg9[%c0_112, %c184], %70 {strides = array<i32>} : memref<24x220xbf16, #tpu.memory_space<vmem>>, vector<24x8xbf16>,
    %c0_113 = arith.constant 0 : index
    %c0_114 = arith.constant 0 : index
    %c12_115 = arith.constant 12 : index
    %c0_116 = arith.constant 0 : index
    %72 = vector.load %arg4[%c0_113, %c0_114, %c12_115, %c0_116] : memref<1x1x40x8xbf16, #tpu.memory_space<vmem>>, vector<1x1x24x8xbf16>
    %73 = vector.shape_cast %72 : vector<1x1x24x8xbf16> to vector<24x8xbf16>
    %c0_117 = arith.constant 0 : index
    %c192 = arith.constant 192 : index
    %74 = vector.load %arg9[%c0_117, %c192] : memref<24x220xbf16, #tpu.memory_space<vmem>>, vector<24x8xbf16>
    tpu.vector_store %arg9[%c0_117, %c192], %73 {strides = array<i32>} : memref<24x220xbf16, #tpu.memory_space<vmem>>, vector<24x8xbf16>,
    %c0_118 = arith.constant 0 : index
    %c0_119 = arith.constant 0 : index
    %c13_120 = arith.constant 13 : index
    %c0_121 = arith.constant 0 : index
    %75 = vector.load %arg4[%c0_118, %c0_119, %c13_120, %c0_121] : memref<1x1x40x8xbf16, #tpu.memory_space<vmem>>, vector<1x1x24x8xbf16>
    %76 = vector.shape_cast %75 : vector<1x1x24x8xbf16> to vector<24x8xbf16>
    %c0_122 = arith.constant 0 : index
    %c200 = arith.constant 200 : index
    %77 = vector.load %arg9[%c0_122, %c200] : memref<24x220xbf16, #tpu.memory_space<vmem>>, vector<24x8xbf16>
    tpu.vector_store %arg9[%c0_122, %c200], %76 {strides = array<i32>} : memref<24x220xbf16, #tpu.memory_space<vmem>>, vector<24x8xbf16>,
    %c0_123 = arith.constant 0 : index
    %c0_124 = arith.constant 0 : index
    %c14_125 = arith.constant 14 : index
    %c0_126 = arith.constant 0 : index
    %78 = vector.load %arg4[%c0_123, %c0_124, %c14_125, %c0_126] : memref<1x1x40x8xbf16, #tpu.memory_space<vmem>>, vector<1x1x24x8xbf16>
    %79 = vector.shape_cast %78 : vector<1x1x24x8xbf16> to vector<24x8xbf16>
    %c0_127 = arith.constant 0 : index
    %c208 = arith.constant 208 : index
    %80 = vector.load %arg9[%c0_127, %c208] : memref<24x220xbf16, #tpu.memory_space<vmem>>, vector<24x8xbf16>
    tpu.vector_store %arg9[%c0_127, %c208], %79 {strides = array<i32>} : memref<24x220xbf16, #tpu.memory_space<vmem>>, vector<24x8xbf16>,
    %c0_128 = arith.constant 0 : index
    %c0_129 = arith.constant 0 : index
    %c0_130 = arith.constant 0 : index
    %c0_131 = arith.constant 0 : index
    %81 = vector.load %arg5[%c0_128, %c0_129, %c0_130, %c0_131] : memref<1x1x24x4xbf16, #tpu.memory_space<vmem>>, vector<1x1x24x4xbf16>
    %82 = vector.shape_cast %81 : vector<1x1x24x4xbf16> to vector<24x4xbf16>
    %c0_132 = arith.constant 0 : index
    %c216 = arith.constant 216 : index
    %83 = vector.load %arg9[%c0_132, %c216] : memref<24x220xbf16, #tpu.memory_space<vmem>>, vector<24x4xbf16>
    tpu.vector_store %arg9[%c0_132, %c216], %82 {strides = array<i32>} : memref<24x220xbf16, #tpu.memory_space<vmem>>, vector<24x4xbf16>,
    %c0_133 = arith.constant 0 : index
    %c0_134 = arith.constant 0 : index
    %84 = vector.load %arg9[%c0_133, %c0_134] : memref<24x220xbf16, #tpu.memory_space<vmem>>, vector<24x220xbf16>
    %c0_135 = arith.constant 0 : index
    %c0_136 = arith.constant 0 : index
    %85 = vector.load %arg6[%c0_135, %c0_136] : memref<220x8xbf16, #tpu.memory_space<vmem>>, vector<220x8xbf16>
    %cst = arith.constant dense<0.000000e+00> : vector<24x8xf32>
    %86 = tpu.matmul %84, %85, %cst {dimension_numbers = #tpu.dot_dimension_numbers<[1], [0], [0], [1], [0, 0, 1, 1], [], []>} : vector<24x220xbf16>, vector<220x8xbf16>, vector<24x8xf32> -> vector<24x8xf32>
    %c0_137 = arith.constant 0 : index
    %c0_138 = arith.constant 0 : index
    %87 = vector.load %arg7[%c0_137, %c0_138] : memref<1x8xf32, #tpu.memory_space<vmem>>, vector<1x8xf32>
    %88 = vector.broadcast %87 : vector<1x8xf32> to vector<24x8xf32>
    %89 = arith.addf %86, %88 : vector<24x8xf32>
    %c0_139 = arith.constant 0 : index
    %c0_140 = arith.constant 0 : index
    %c0_141 = arith.constant 0 : index
    %c0_142 = arith.constant 0 : index
    %90 = vector.load %arg8[%c0_139, %c0_140, %c0_141, %c0_142] : memref<1x1x24x8xf32, #tpu.memory_space<vmem>>, vector<1x1x24x8xf32>
    %91 = vector.shape_cast %90 : vector<1x1x24x8xf32> to vector<24x8xf32>
    %92 = vector.shape_cast %89 : vector<24x8xf32> to vector<1x1x24x8xf32>
    tpu.vector_store %arg8[%c0_139, %c0_140, %c0_141, %c0_142], %92 {strides = array<i32>} : memref<1x1x24x8xf32, #tpu.memory_space<vmem>>, vector<1x1x24x8xf32>,
    return
  }
  func.func @transform_0(%arg0: i32, %arg1: i32) -> (i32, i32, i32, i32) {
    %c0_i32 = arith.constant 0 : i32
    %0 = arith.addi %arg1, %c0_i32 : i32
    %c0_i32_0 = arith.constant 0 : i32
    %c0_i32_1 = arith.constant 0 : i32
    %c0_i32_2 = arith.constant 0 : i32
    return %arg0, %0, %c0_i32_0, %c0_i32_1 : i32, i32, i32, i32
  }
  func.func @transform_1(%arg0: i32, %arg1: i32) -> (i32, i32, i32, i32) {
    %c1_i32 = arith.constant 1 : i32
    %0 = arith.addi %arg1, %c1_i32 : i32
    %c0_i32 = arith.constant 0 : i32
    %c0_i32_0 = arith.constant 0 : i32
    %c0_i32_1 = arith.constant 0 : i32
    return %arg0, %0, %c0_i32, %c0_i32_0 : i32, i32, i32, i32
  }
  func.func @transform_2(%arg0: i32, %arg1: i32) -> (i32, i32, i32, i32) {
    %c2_i32 = arith.constant 2 : i32
    %0 = arith.addi %arg1, %c2_i32 : i32
    %c0_i32 = arith.constant 0 : i32
    %c0_i32_0 = arith.constant 0 : i32
    %c0_i32_1 = arith.constant 0 : i32
    return %arg0, %0, %c0_i32, %c0_i32_0 : i32, i32, i32, i32
  }
  func.func @transform_3(%arg0: i32, %arg1: i32) -> (i32, i32, i32, i32) {
    %c0_i32 = arith.constant 0 : i32
    %c0_i32_0 = arith.constant 0 : i32
    %c0_i32_1 = arith.constant 0 : i32
    return %arg0, %arg1, %c0_i32, %c0_i32_0 : i32, i32, i32, i32
  }
  func.func @transform_4(%arg0: i32, %arg1: i32) -> (i32, i32) {
    %c0_i32 = arith.constant 0 : i32
    %c0_i32_0 = arith.constant 0 : i32
    %c0_i32_1 = arith.constant 0 : i32
    return %c0_i32, %c0_i32_0 : i32, i32
  }
  func.func @transform_5(%arg0: i32, %arg1: i32) -> (i32, i32) {
    %c0_i32 = arith.constant 0 : i32
    %c0_i32_0 = arith.constant 0 : i32
    %c0_i32_1 = arith.constant 0 : i32
    return %c0_i32, %c0_i32_0 : i32, i32
  }
  func.func @transform_6(%arg0: i32, %arg1: i32) -> (i32, i32, i32, i32) {
    %c0_i32 = arith.constant 0 : i32
    %c0_i32_0 = arith.constant 0 : i32
    %c0_i32_1 = arith.constant 0 : i32
    return %arg0, %arg1, %c0_i32, %c0_i32_0 : i32, i32, i32, i32
  }
}

</mosaic_0001>

<bundles_post_ra>
// kernel: down_residual_conv_block.2
= control target key start
LH: loop header
LB: loop body
LE: loop exit
PB: predicated region body
PF: predicated region fallthrough
CT: control target
= control target key end

     0   :  { %s854_s18 = smov 0   ;;  %s856_s19 = smov 0   ;;  %s955_s0 = inlined_call_operand.vmem [shape: bf16[2,10,16,36], index: 0, kind: input, shape index: {}, may-alias: {0,1,2}]   ;;  %s956_s1 = inlined_call_operand.vmem [shape: bf16[2,10,16,36], index: 1, kind: input, shape index: {}, may-alias: {0,1,2}]   ;;  %s957_s2 = inlined_call_operand.vmem [shape: bf16[2,10,16,36], index: 2, kind: input, shape index: {}, may-alias: {0,1,2}]   ;;  %s958_s3 = inlined_call_operand.vmem [shape: bf16[108,8], index: 3, kind: input, shape index: {}]   ;;  %s959_s4 = inlined_call_operand.vmem [shape: f32[1,8], index: 4, kind: input, shape index: {}]   ;;  %s960_s5 = inlined_call_operand.vmem [shape: bf16[2,4,16,8], index: 5, kind: output, shape index: {}]  }
   0x1   :  { %s858_s20 = smov 0   ;;  %s860_s21 = smov 0  }
   0x2   :  { %s862_s22 = smov 0  }
   0x3 LB: > { %s24_s23 = sadd.s32 1, %s810_s20  ;;  %s27_s24 = sadd.s32 1, %s814_s21  ;;  %s818_s22 = sphi %s862_s22, %s15_s22   ;;  %s814_s21 = sphi %s860_s21, %s964_s21   ;;  %s810_s20 = sphi %s858_s20, %s963_s20   ;;  %s806_s19 = sphi %s856_s19, %s962_s19   ;;  %s802_s18 = sphi %s854_s18, %s961_s18  }
   0x4   : > { %p25_p0 = scmp.ge.s32.totalorder %s24_s23, 4  ;;  %p672_p1 = scmp.ge.s32.totalorder %s818_s22, 1 }
   0x5   : > { %p259_p2 = scmp.lt.s32.totalorder %s818_s22, 9 }
   0x6   : > { %s966_s23 = smov (%p25_p0, %s24_s23), 0  ;;  %s968_s24 = smov (!%p25_p0, %s27_s24), %s814_s21 }
   0x7   : > { %p260_p3 = pnand %p672_p1, %p259_p2  ;;  %p29_p4 = scmp.ge.s32.totalorder %s968_s24, 2 }
   0x8   : > { %s887_s25 = sshll.u32 (!%p260_p3), %s802_s18, 1  ;;  %p319_p5 = scmp.lt.s32.totalorder (!%p260_p3), %s806_s19, 1 }
   0x9   : > { %s970_s24 = smov (%p29_p4, %s968_s24), 0  ;;  %263 = sbr.rel (%p260_p3) target bundleno = 351 (0x15f), region = 40 }
   0xa   : > { %s330_s26 = sadd.s32 (!%p260_p3), 1, %s887_s25  ;;  %s343_s29 = sadd.s32 (!%p260_p3), 2, %s887_s25 }
   0xb   : > { %p333_p6 = scmp.lt.s32.totalorder (!%p260_p3), %s330_s26, 9  ;;  %p346_p7 = scmp.lt.s32.totalorder (!%p260_p3), %s343_s29, 9 }
   0xc   : > { %p321_p8 = scmp.lt.s32.totalorder (!%p260_p3), %s887_s25, 9  ;;  %s822_s6 = smov (!%p260_p3), 36  }
   0xd   : > { %p357_p9 = scmp.lt.s32.totalorder (!%p260_p3), %s802_s18, 3 }
   0xe   : > { %vm469_vm0 = vcmask 1045504   ;;  %v820_v0 = vmov 0.0   ;;  %v772_v1 = vld [vmem:[%s958_s3 + $0x30] sm:$0x3f]   ;;  %s972_s19 = smov (!%p319_p5, %s806_s19), 1  ;;  %v773_v3 = vld [vmem:[%s958_s3 + $0x28] sm:$0xff]  }
   0xf   : > { %709 = vmatprep.subr.bf16.mxu0 %v820_v0  ;;  %v471_v2 = vsel %vm469_vm0, %v772_v1, 0  ;;  %s897_s30 = smul.u32 20, %s972_s19  ;;  %s974_s26 = smov (!%p333_p6, %s330_s26), 9  ;;  %v774_v4 = vld [vmem:[%s958_s3 + $0x20] sm:$0xff]   ;;  %vm821_vm1 = vmmov 0   ;;  %v775_v7 = vld [vmem:[%s958_s3 + $0x18] sm:$0xff]  }
  0x10   : > { %710 = vmatpush3.bf16.msra.mxu0 %v471_v2  ;;  %s976_s29 = smov (!%p346_p7, %s343_s29), 9  ;;  %s677_s8 = sshll.u32 %s974_s26, 1  ;;  %723 = vmatprep.mubr.msk.bf16.mxu0 %vm821_vm1, %v820_v0  ;;  %v776_v10 = vld [vmem:[%s958_s3 + $0x10] sm:$0xff]   ;;  %vm367_vm2 = vcmask 289792   ;;  %v777_v13 = vld [vmem:[%s958_s3 + $0x8] sm:$0xff]   ;;  %v778_v14 = vld [vmem:[%s958_s3] sm:$0xff]  }
  0x11   : > { %711 = vmatprep.subr.bf16.mxu0 %v820_v0  ;;  %s337_s9 = sadd.s32 %s897_s30, %s677_s8  ;;  %s680_s10 = sshll.u32 %s976_s29, 1  ;;  %vm380_vm3 = vcmask 584992   ;;  %vm393_vm4 = vcmask 880192   ;;  %vm465_vm5 = vcmask 883712   ;;  %v685_v20 = vld [vmem:[%s959_s4] ss:$0 sm:$0xff] }
  0x12   : > { %s678_s13 = sshll.u32 %s337_s9, 2  ;;  %s350_s14 = sadd.s32 %s897_s30, %s680_s10  ;;  %vm522_vm6 = vcmask 60416  }
  0x13   : > { %s339_s17 = scalar_lea.vmem %s956_s1, %s678_s13  ;;  %s681_s27 = sshll.u32 %s350_s14, 2 }
  0x14   : > { %712 = vmatpush3.bf16.msra.mxu0 %v773_v3  ;;  %v370_v5 = vld [vmem:[%s339_s17] sm:$0xf]  ;;  %s352_s29 = scalar_lea.vmem %s957_s2, %s681_s27  ;;  %s823_s9 = smov 72   ;;  %v371_v8 = vld [vmem:[%s339_s17 + $0x4] sm:$0xf] }
  0x15   : > { %713 = vmatprep.subr.bf16.mxu0 %v820_v0  ;;  %374 = vrot.lane.b32.xlu0 %v370_v5, %s822_s6  ;;  %v383_v6 = vld [vmem:[%s352_s29] sm:$0xf]  ;;  %s978_s25 = smov (!%p321_p8, %s887_s25), 9  ;;  %v384_v9 = vld [vmem:[%s352_s29 + $0x4] sm:$0xf]  ;;  %s980_s18 = smov (!%p357_p9, %s802_s18), 3 }
  0x16   : > { %387 = vrot.lane.b32.xlu1 %v383_v6, %s823_s9  ;;  %s674_s10 = sshll.u32 %s978_s25, 1  ;;  %s682_s28 = sshll.u32 %s980_s18, 1 }
  0x17   : > { %s325_s11 = sadd.s32 %s897_s30, %s674_s10  ;;  %s683_s29 = sshll.u32 %s972_s19, 3 }
  0x18   : > { %714 = vmatpush3.bf16.msra.mxu0 %v774_v4  ;;  %s675_s14 = sshll.u32 %s325_s11, 2 }
  0x19   : > { %715 = vmatprep.subr.bf16.mxu0 %v820_v0  ;;  %376 = vrot.lane.b32.xlu0 %v371_v8, %s822_s6  ;;  %s327_s27 = scalar_lea.vmem %s955_s0, %s675_s14  ;;  %s361_s6 = sadd.s32 %s683_s29, %s682_s28 }
  0x1a   : > { %389 = vrot.lane.b32.xlu1 %v384_v9, %s823_s9  ;;  %v365_v11 = vld [vmem:[%s327_s27] sm:$0xf]  ;;  %v366_v12 = vld [vmem:[%s327_s27 + $0x4] sm:$0xf]  ;;  %s684_s9 = sshll.u32 %s361_s6, 2 }
  0x1b   : > { %368 = vst.msk [vmem:[#allocation2] sm:$0xf] %vm367_vm2, %v365_v11  ;;  %369 = vst.msk [vmem:[#allocation2 + $0x4] sm:$0xf] %vm367_vm2, %v366_v12  ;;  %s363_s12 = scalar_lea.vmem %s960_s5, %s684_s9 }
  0x1c   : > { %716 = vmatpush3.bf16.msra.mxu0 %v775_v7 }
  0x1d   : > { %717 = vmatprep.subr.bf16.mxu0 %v820_v0 }
  0x20   : > { %718 = vmatpush3.bf16.msra.mxu0 %v776_v10 }
  0x21   : > { %719 = vmatprep.subr.bf16.mxu0 %v820_v0 }
  0x24   : > { %720 = vmatpush3.bf16.msra.mxu0 %v777_v13 }
  0x25   : > { %721 = vmatprep.subr.bf16.mxu0 %v820_v0 }
  0x28   : > { %722 = vmatpush3.bf16.msra.mxu0 %v778_v14 }
  0x87   : > { %v375_v15 = vpop.permute.xlu0 %374 }
  0x88   : > { %381 = vst.msk [vmem:[#allocation2] sm:$0xf] %vm380_vm3, %v375_v15  ;;  %v388_v16 = vpop.permute.xlu1 %387 }
  0x89   : > { %394 = vst.msk [vmem:[#allocation2] sm:$0xf] %vm393_vm4, %v388_v16 }
  0x8b   : > { %v377_v17 = vpop.permute.xlu0 %376 }
  0x8c   : > { %382 = vst.msk [vmem:[#allocation2 + $0x4] sm:$0xf] %vm380_vm3, %v377_v17  ;;  %v390_v18 = vpop.permute.xlu1 %389 }
  0x8d   : > { %395 = vst.msk [vmem:[#allocation2 + $0x4] sm:$0xf] %vm393_vm4, %v390_v18 }
  0x94   : > { %v779_v19 = vld [vmem:[#allocation2] sm:$0xff]  }
  0x95   : > { %724 = vmatmul.mubr.msk.bf16.vlgmr.msra.gmra.mxu0 %vm465_vm5, %v779_v19 }
 0x155   : > { %v507_v21 = vpop.f32.mrf.mxu0 }
 0x156   : > { %v508_v22 = vadd.f32 %v685_v20, %v507_v21 }
 0x157   : > { %v725_v23 = vpop.f32.mrf.mxu0 }
 0x158   : > { %v699_v24 = vpack.c.bf16 %v508_v22, %v508_v22 }
 0x159   : > { %v510_v25 = vpop.f32.mrf.mxu0 }
 0x15a   : > { %523 = vst.msk [vmem:[%s363_s12] sm:$0xf] %vm522_vm6, %v699_v24  ;;  %v511_v26 = vadd.f32 %v685_v20, %v510_v25 }
 0x15b   : > { %v726_v27 = vpop.f32.mrf.mxu0 }
 0x15c   : > { %v700_v28 = vpack.c.bf16 %v511_v26, %v511_v26 }
 0x15e   : > { %524 = vst.msk [vmem:[%s363_s12 + $0x4] sm:$0xf] %vm522_vm6, %v700_v28 }
 0x15f PF: > { %s15_s22 = sadd.s32 1, %s818_s22   ;;  %s961_s18 = smov %s810_s20 }
 0x160   : > { %p12_p10 = scmp.ge.s32.totalorder %s15_s22, 10   ;;  %s962_s19 = smov %s814_s21 }
 0x161   : > { %s963_s20 = smov %s966_s23  ;;  %s964_s21 = smov %s970_s24 }
 0x162   :  { %14 = sbr.rel (!%p12_p10) target bundleno = 3 (0x3), region = 76 }

// kernel: down_residual_conv_block.3
= control target key start
LH: loop header
LB: loop body
LE: loop exit
PB: predicated region body
PF: predicated region fallthrough
CT: control target
= control target key end

     0   :  { %s1966_s21 = smov 0   ;;  %s1968_s22 = smov 0   ;;  %s2782_s0 = inlined_call_operand.vmem [shape: bf16[2,6,40,8], index: 0, kind: input, shape index: {}, may-alias: {0,1,2}]   ;;  %s2783_s1 = inlined_call_operand.vmem [shape: bf16[2,6,40,8], index: 1, kind: input, shape index: {}, may-alias: {0,1,2}]   ;;  %s2784_s2 = inlined_call_operand.vmem [shape: bf16[2,6,40,8], index: 2, kind: input, shape index: {}, may-alias: {0,1,2}]   ;;  %s2785_s3 = inlined_call_operand.vmem [shape: bf16[2,4,24,4], index: 3, kind: input, shape index: {}]   ;;  %s2786_s4 = inlined_call_operand.vmem [shape: bf16[220,8], index: 4, kind: input, shape index: {}]   ;;  %s2787_s5 = inlined_call_operand.vmem [shape: f32[1,8], index: 5, kind: input, shape index: {}]   ;;  %s2788_s6 = inlined_call_operand.vmem [shape: f32[2,4,24,8], index: 6, kind: output, shape index: {}]  }
   0x1   :  { %s1970_s23 = smov 0   ;;  %s1972_s24 = smov 0  }
   0x2   :  { %s1974_s25 = smov 0  }
   0x3 LB: > { %s25_s26 = sadd.s32 1, %s1905_s23  ;;  %s28_s27 = sadd.s32 1, %s1909_s24  ;;  %s1913_s25 = sphi %s1974_s25, %s16_s25   ;;  %s1909_s24 = sphi %s1972_s24, %s2806_s24   ;;  %s1905_s23 = sphi %s1970_s23, %s2805_s23   ;;  %s1901_s22 = sphi %s1968_s22, %s2804_s22   ;;  %s1897_s21 = sphi %s1966_s21, %s2803_s21  }
   0x4   : > { %p26_p0 = scmp.ge.s32.totalorder %s25_s26, 4  ;;  %p1722_p1 = scmp.ge.s32.totalorder %s1913_s25, 1 }
   0x5   : > { %p288_p2 = scmp.lt.s32.totalorder %s1913_s25, 9 }
   0x6   : > { %s2808_s26 = smov (%p26_p0, %s25_s26), 0  ;;  %s2810_s27 = smov (!%p26_p0, %s28_s27), %s1909_s24 }
   0x7   : > { %p289_p3 = pnand %p1722_p1, %p288_p2  ;;  %p30_p4 = scmp.ge.s32.totalorder %s2810_s27, 2 }
   0x8   : > { %p355_p5 = scmp.lt.s32.totalorder (!%p289_p3), %s1901_s22, 1  ;;  %p357_p6 = scmp.lt.s32.totalorder (!%p289_p3), %s1897_s21, 5 }
   0x9   : > { %s2812_s27 = smov (%p30_p4, %s2810_s27), 0  ;;  %292 = sbr.rel (%p289_p3) target bundleno = 505 (0x1f9), region = 44 }
   0xa   : > { %s364_s7 = sadd.s32 (!%p289_p3), 1, %s1897_s21  ;;  %s375_s14 = sadd.s32 (!%p289_p3), 2, %s1897_s21 }
   0xb   : > { %p2007_p7 = scmp.lt.s32.totalorder (!%p289_p3), %s364_s7, 5  ;;  %s1915_s15 = smov (!%p289_p3), 24  }
   0xc   : > { %p2046_p8 = scmp.lt.s32.totalorder (!%p289_p3), %s375_s14, 5  ;;  %s1916_s17 = smov (!%p289_p3), 16  }
   0xd   : > { %s1918_s10 = smov (!%p289_p3), 8   ;;  %p388_p9 = scmp.lt.s32.totalorder (!%p289_p3), %s1897_s21, 3 }
   0xe   : > { %s2814_s22 = smov (!%p355_p5, %s1901_s22), 1  ;;  %vm508_vm0 = vcmask 1040384   ;;  %vm509_vm1 = vcmask 1044484   ;;  %vm474_vm2 = vcmask 1042432   ;;  %vm475_vm3 = vcmask 1046532   ;;  %s2816_s7 = smov (!%p2007_p7, %s364_s7), 5 }
   0xf   : > { %s358_s28 = scalar_select %p357_p6, %s1897_s21, 5  ;;  %vm538_vm4 = vsmask.f32 256  ;;  %vm2016_vm5 = vmor %vm508_vm0, %vm509_vm1  ;;  %vm539_vm6 = vsmask.f32 4368  ;;  %vm612_vm12 = vcmask 1041408  }
  0x10   : > { %s2003_s29 = smul.u32 30, %s2814_s22  ;;  %vm2025_vm7 = vmor %vm474_vm2, %vm475_vm3  ;;  %vm416_vm8 = vsmask.f32 3328  ;;  %vm417_vm9 = vsmask.f32 7440  ;;  %s2818_s14 = smov (!%p2046_p8, %s375_s14), 5 }
  0x11   : > { %s1794_s30 = smul.u32 5, %s358_s28  ;;  %vm2075_vm10 = vmor %vm538_vm4, %vm539_vm6  ;;  %vm613_vm13 = vcmask 1045508   ;;  %vm642_vm14 = vsmask.f32 1280  ;;  %vm643_vm15 = vsmask.f32 5392 }
  0x12   : > { %s1796_s18 = smul.u32 5, %s2816_s7  ;;  %vm2088_vm11 = vmor %vm416_vm8, %vm417_vm9  ;;  %vm408_vm2 = vcmask 60416   ;;  %s1926_s7 = smov 88   ;;  %v1858_v60 = vld [vmem:[%s2786_s4 + $0x28] sm:$0xff]   ;;  %vm1504_vm3 = vcmask 1045504   ;;  %vm462_vm4 = vcmask 126016  }
  0x13   : > { %s361_s8 = sadd.s32 %s2003_s29, %s1794_s30  ;;  %s1797_s28 = smul.u32 5, %s2818_s14  ;;  %vm2142_vm0 = vmor %vm612_vm12, %vm613_vm13  ;;  %v1864_v42 = vld [vmem:[%s2786_s4 + $0x68] sm:$0x3f]   ;;  %vm496_vm6 = vcmask 191616   ;;  %vm581_vm8 = vcmask 322816   ;;  %vm600_vm9 = vcmask 388416  }
  0x14   : > { %s1723_s9 = sshll.u32 %s361_s8, 2  ;;  %s371_s19 = sadd.s32 %s1796_s18, %s2003_s29  ;;  %vm2177_vm1 = vmor %vm642_vm14, %vm643_vm15  ;;  %vm742_vm12 = vcmask 650816   ;;  %vm793_vm13 = vcmask 716416   ;;  %vm824_vm14 = vcmask 782016   ;;  %vm855_vm15 = vcmask 847616  }
  0x15   : > { %s2014_s13 = scalar_lea.vmem %s2782_s0, %s1723_s9  ;;  %s1724_s20 = sshll.u32 %s371_s19, 2 }
  0x16   : > { %v500_v1 = vld [vmem:[%s2014_s13] sm:$0x8]  ;;  %v501_v2 = vld [vmem:[%s2014_s13 + $0x4] sm:$0xf]  ;;  %v468_v10 = vld [vmem:[%s2014_s13 + $0x8] sm:$0xf]  ;;  %s2098_s8 = scalar_lea.vmem %s2783_s1, %s1724_s20  ;;  %s382_s11 = sadd.s32 %s1797_s28, %s2003_s29 }
  0x17   : > { %v466_v3 = vld [vmem:[%s2014_s13] sm:$0xe]  ;;  %v1729_v4 = vrot.slane %v500_v1, 11  ;;  %v513_v5 = vrot.slane %v501_v2, 7  ;;  %v467_v6 = vld [vmem:[%s2014_s13 + $0x4] sm:$0xf] }
  0x18   : > { %v1728_v8 = vrot.slane %v466_v3, 9  ;;  %v479_v9 = vrot.slane %v467_v6, 5  ;;  %v469_v11 = vld [vmem:[%s2014_s13 + $0xc] sm:$0x1]  ;;  %v482_v13 = vrot.slane %v468_v10, 5  ;;  %s1917_s9 = smov 32  }
  0x19   : > { %v514_v12 = vsel %vm2016_vm5, %v1729_v4, %v513_v5  ;;  %v485_v14 = vrot.slane %v469_v11, 5  ;;  %v502_v15 = vld [vmem:[%s2014_s13 + $0x8] sm:$0xf]  ;;  %v503_v16 = vld [vmem:[%s2014_s13 + $0xc] sm:$0x7]  ;;  %v515_v23 = vrot.slane %v513_v5, 4 }
  0x1a   : > { %521 = vrot.lane.b32.xlu0 %v514_v12, %s1915_s15  ;;  %v480_v17 = vsel %vm2025_vm7, %v1728_v8, %v479_v9  ;;  %v481_v18 = vrot.slane %v479_v9, 4  ;;  %v516_v19 = vrot.slane %v502_v15, 7  ;;  %v519_v20 = vrot.slane %v503_v16, 7  ;;  %v534_v21 = vld [vmem:[%s2014_s13] sm:$0x8]  ;;  %s1725_s12 = sshll.u32 %s382_s11, 2 }
  0x1b   : > { %487 = vrot.lane.b32.xlu1 %v480_v17, %s1916_s17  ;;  %v484_v22 = vrot.slane %v482_v13, 4  ;;  %v535_v24 = vld [vmem:[%s2014_s13 + $0x4] sm:$0xf]  ;;  %v542_v25 = vshrl.u32 %v534_v21, 16  ;;  %v412_v30 = vld [vmem:[%s2014_s13] sm:$0xf]  ;;  %s2123_s16 = scalar_lea.vmem %s2784_s2, %s1725_s12 }
  0x1c   : > { %v483_v26 = vsel %vm2025_vm7, %v481_v18, %v482_v13  ;;  %v518_v27 = vrot.slane %v516_v19, 4  ;;  %v547_v28 = vshrl.u32 %v535_v24, 16  ;;  %v550_v29 = vshll.u32 %v535_v24, 16  ;;  %v413_v34 = vld [vmem:[%s2014_s13 + $0x4] sm:$0xf]  ;;  %s1919_s18 = smov 40  }
  0x1d   : > { %v486_v31 = vsel %vm2025_vm7, %v484_v22, %v485_v14  ;;  %v517_v32 = vsel %vm2016_vm5, %v515_v23, %v516_v19  ;;  %v1730_v33 = vrot.slane %v542_v25, 11  ;;  %v420_v35 = vshrl.u32 %v412_v30, 16  ;;  %v414_v36 = vld [vmem:[%s2014_s13 + $0x8] sm:$0xf]  ;;  %v415_v41 = vld [vmem:[%s2014_s13 + $0xc] sm:$0x1] }
  0x1e   : > { %489 = vrot.lane.b32.xlu0 %v483_v26, %s1916_s17  ;;  %v520_v37 = vsel %vm2016_vm5, %v518_v27, %v519_v20  ;;  %v549_v38 = vrot.slane %v547_v28, 7  ;;  %v423_v39 = vshll.u32 %v412_v30, 16  ;;  %v429_v40 = vshll.u32 %v413_v34, 16  ;;  %v536_v47 = vld [vmem:[%s2014_s13 + $0x8] sm:$0xf]  ;;  %s1920_s19 = smov 48  }
  0x1f   : > { %491 = vrot.lane.b32.xlu1 %v486_v31, %s1916_s17  ;;  %v422_v43 = vrot.slane %v420_v35, 4  ;;  %v433_v44 = vshrl.u32 %v413_v34, 16  ;;  %v439_v45 = vshll.u32 %v414_v36, 16  ;;  %v443_v46 = vshrl.u32 %v414_v36, 16  ;;  %v537_v52 = vld [vmem:[%s2014_s13 + $0xc] sm:$0xf] }
  0x20   : > { %v552_v48 = vor.u32 %v550_v29, %v549_v38  ;;  %v425_v49 = vrot.slane %v423_v39, 5  ;;  %v431_v50 = vrot.slane %v429_v40, 5  ;;  %v449_v51 = vshll.u32 %v415_v41, 16  ;;  %v1006_v16 = vld [vmem:[%s2098_s8 + $0x8] sm:$0xf]  ;;  %s1921_s20 = smov 56  }
  0x21   : > { %v441_v53 = vrot.slane %v439_v45, 5  ;;  %v445_v54 = vrot.slane %v443_v46, 4  ;;  %v435_v55 = vrot.slane %v433_v44, 4  ;;  %v556_v56 = vshrl.u32 %v536_v47, 16  ;;  %v1007_v19 = vld [vmem:[%s2098_s8 + $0xc] sm:$0xf] }
  0x22   : > { %525 = vrot.lane.b32.xlu0 %v520_v37, %s1915_s15  ;;  %v553_v57 = vsel %vm2075_vm10, %v1730_v33, %v552_v48  ;;  %v426_v58 = vor.u32 %v425_v49, %v422_v43  ;;  %v565_v59 = vshrl.u32 %v537_v52, 16  ;;  %v451_v62 = vrot.slane %v449_v51, 5  ;;  %v1005_v21 = vld [vmem:[%s2098_s8 + $0x4] sm:$0x8]  ;;  %v586_v23 = vld [vmem:[%s2014_s13 + $0x8] sm:$0xf] }
  0x23   : > { %523 = vrot.lane.b32.xlu1 %v517_v32, %s1915_s15  ;;  %v446_v61 = vor.u32 %v445_v54, %v441_v53  ;;  %v436_v63 = vor.u32 %v435_v55, %v431_v50  ;;  %v558_v1 = vrot.slane %v556_v56, 7  ;;  %v568_v4 = vshll.u32 %v537_v52, 16  ;;  %v638_v22 = vld [vmem:[%s2014_s13 + $0x4] sm:$0xc]  ;;  %v605_v27 = vld [vmem:[%s2014_s13 + $0x8] sm:$0xf] }
  0x24   : > { %v427_v2 = vrot.slane %v426_v58, 4  ;;  %v567_v3 = vrot.slane %v565_v59, 7  ;;  %v559_v5 = vshll.u32 %v536_v47, 16  ;;  %v554_v11 = vrot.slane %v549_v38, 4  ;;  %v585_v24 = vld [vmem:[%s2014_s13 + $0x4] sm:$0xf] }
  0x25   : > { %v447_v6 = vrot.slane %v446_v61, 4  ;;  %v437_v8 = vrot.slane %v436_v63, 4  ;;  %v563_v10 = vrot.slane %v558_v1, 4  ;;  %v1015_v20 = vrot.slane %v1006_v16, 7  ;;  %v604_v25 = vld [vmem:[%s2014_s13 + $0x4] sm:$0xc] }
  0x26   : > { %v432_v9 = vsel %vm2088_vm11, %v427_v2, %v431_v50  ;;  %v570_v14 = vor.u32 %v568_v4, %v567_v3  ;;  %v561_v15 = vor.u32 %v559_v5, %v558_v1  ;;  %v1018_v26 = vrot.slane %v1007_v19, 7  ;;  %v1054_v28 = vld [vmem:[%s2123_s16 + $0x4] sm:$0xf]  ;;  %v639_v31 = vld [vmem:[%s2014_s13 + $0x8] sm:$0xf]  ;;  %s1928_s11 = smov 104  }
  0x27   : > { %572 = vrot.lane.b32.xlu1 %v553_v57, %s1917_s9  ;;  %453 = vrot.lane.b32.xlu0 %v432_v9, %s1918_s10  ;;  %v452_v12 = vsel %vm2088_vm11, %v447_v6, %v451_v62  ;;  %v442_v13 = vsel %vm2088_vm11, %v437_v8, %v441_v53  ;;  %v1017_v29 = vrot.slane %v1015_v20, 4  ;;  %v1737_v30 = vrot.slane %v1005_v21, 11  ;;  %v1008_v34 = vld [vmem:[%s2098_s8 + $0x10] sm:$0x7]  ;;  %v1053_v37 = vld [vmem:[%s2123_s16] sm:$0xf] }
  0x28   : > { %v571_v17 = vsel %vm2075_vm10, %v563_v10, %v570_v14  ;;  %v562_v18 = vsel %vm2075_vm10, %v554_v11, %v561_v15  ;;  %v646_v32 = vshrl.u32 %v638_v22, 16  ;;  %v649_v33 = vshll.u32 %v638_v22, 16  ;;  %v640_v43 = vld [vmem:[%s2014_s13 + $0xc] sm:$0xf]  ;;  %v1055_v56 = vld [vmem:[%s2123_s16 + $0x8] sm:$0xf] }
  0x29   : > { %v1067_v35 = vshll.u32 %v1054_v28, 16  ;;  %v1071_v36 = vshrl.u32 %v1054_v28, 16  ;;  %v1731_v38 = vrot.slane %v604_v25, 10  ;;  %v617_v39 = vrot.slane %v605_v27, 6  ;;  %v606_v46 = vld [vmem:[%s2014_s13 + $0xc] sm:$0xf] }
  0x2a   : > { %v655_v40 = vshrl.u32 %v639_v31, 16  ;;  %v658_v41 = vshll.u32 %v639_v31, 16  ;;  %v1019_v44 = vsel %vm2016_vm5, %v1017_v29, %v1018_v26  ;;  %v1016_v45 = vsel %vm2016_vm5, %v1737_v30, %v1015_v20  ;;  %v587_v2 = vld [vmem:[%s2014_s13 + $0xc] sm:$0xf]  ;;  %v641_v5 = vld [vmem:[%s2014_s13 + $0x10] sm:$0x7] }
  0x2b   : > { %457 = vrot.lane.b32.xlu1 %v452_v12, %s1918_s10  ;;  %455 = vrot.lane.b32.xlu0 %v442_v13, %s1918_s10  ;;  %v648_v47 = vrot.slane %v646_v32, 6  ;;  %v651_v48 = vrot.slane %v649_v33, 7  ;;  %v1020_v50 = vrot.slane %v1018_v26, 4  ;;  %v1021_v51 = vrot.slane %v1008_v34, 7  ;;  %v607_v6 = vld [vmem:[%s2014_s13 + $0x10] sm:$0x3] }
  0x2c   : > { %v1058_v52 = vshrl.u32 %v1053_v37, 16  ;;  %v1061_v53 = vshll.u32 %v1053_v37, 16  ;;  %v665_v54 = vshrl.u32 %v640_v43, 16  ;;  %v668_v55 = vshll.u32 %v640_v43, 16  ;;  %v1056_v28 = vld [vmem:[%s2123_s16 + $0xc] sm:$0x1] }
  0x2d   : > { %v2147_v57 = vrot.slane %v1067_v35, 5  ;;  %v1073_v58 = vrot.slane %v1071_v36, 4  ;;  %v619_v59 = vrot.slane %v617_v39, 4  ;;  %v620_v61 = vrot.slane %v606_v46, 6  ;;  %v698_v29 = vld [vmem:[%s2014_s13 + $0xc] sm:$0xf] }
  0x2e   : > { %v657_v62 = vrot.slane %v655_v40, 6  ;;  %v660_v63 = vrot.slane %v658_v41, 7  ;;  %v618_v1 = vsel %vm2142_vm0, %v1731_v38, %v617_v39  ;;  %v652_v3 = vor.u32 %v651_v48, %v648_v47  ;;  %v1036_v30 = vld [vmem:[%s2123_s16 + $0x4] sm:$0xf]  ;;  %v1103_v39 = vld [vmem:[%s2123_s16] sm:$0xe] }
  0x2f   : > { %576 = vrot.lane.b32.xlu1 %v571_v17, %s1917_s9  ;;  %574 = vrot.lane.b32.xlu0 %v562_v18, %s1917_s9  ;;  %v1081_v4 = vshrl.u32 %v1055_v56, 16  ;;  %v1077_v8 = vshll.u32 %v1055_v56, 16  ;;  %v1060_v9 = vrot.slane %v1058_v52, 4  ;;  %v1063_v10 = vrot.slane %v1061_v53, 5  ;;  %v696_v17 = vld [vmem:[%s2014_s13 + $0x4] sm:$0x8] }
  0x30   : > { %v1022_v11 = vsel %vm2016_vm5, %v1020_v50, %v1021_v51  ;;  %v667_v12 = vrot.slane %v665_v54, 6  ;;  %v670_v13 = vrot.slane %v668_v55, 7  ;;  %v1074_v14 = vor.u32 %v1073_v58, %v2147_v57  ;;  %v697_v18 = vld [vmem:[%s2014_s13 + $0x8] sm:$0xf]  ;;  %v1104_v36 = vld [vmem:[%s2123_s16 + $0x4] sm:$0xf] }
  0x31   : > { %v621_v15 = vsel %vm2142_vm0, %v619_v59, %v620_v61  ;;  %v2163_v16 = vor.u32 %v660_v63, %v657_v62  ;;  %v675_v19 = vshrl.u32 %v641_v5, 16  ;;  %v678_v20 = vshll.u32 %v641_v5, 16  ;;  %v748_v40 = vld [vmem:[%s2098_s8 + $0x8] sm:$0xf]  ;;  %v1035_v41 = vld [vmem:[%s2123_s16] sm:$0xf] }
  0x32   : > { %v2167_v21 = vrot.slane %v652_v3, 4  ;;  %v622_v22 = vrot.slane %v620_v61, 4  ;;  %v2170_v26 = vrot.slane %v1077_v8, 5  ;;  %v1064_v27 = vor.u32 %v1063_v10, %v1060_v9  ;;  %v797_v52 = vld [vmem:[%s2098_s8] sm:$0xe]  ;;  %s1929_s28 = smov 112  }
  0x33   : > { %593 = vrot.lane.b32.xlu1 %v586_v23, %s1919_s18  ;;  %591 = vrot.lane.b32.xlu0 %v585_v24, %s1919_s18  ;;  %v623_v23 = vrot.slane %v607_v6, 6  ;;  %v1083_v24 = vrot.slane %v1081_v4, 4  ;;  %v663_v25 = vrot.slane %v2163_v16, 4  ;;  %v671_v32 = vor.u32 %v670_v13, %v667_v12  ;;  %v798_v53 = vld [vmem:[%s2098_s8 + $0x4] sm:$0xf]  ;;  %s2820_s21 = smov (!%p388_p9, %s1897_s21), 3 }
  0x34   : > { %v2181_v33 = vrot.slane %v1074_v14, 4  ;;  %v1732_v34 = vrot.slane %v696_v17, 11  ;;  %v706_v35 = vrot.slane %v697_v18, 7  ;;  %v677_v37 = vrot.slane %v675_v19, 6  ;;  %v1105_v55 = vld [vmem:[%s2123_s16 + $0x8] sm:$0xf] }
  0x35   : > { %v680_v38 = vrot.slane %v678_v20, 7  ;;  %v1084_v43 = vor.u32 %v1083_v24, %v2170_v26  ;;  %v709_v46 = vrot.slane %v698_v29, 7  ;;  %v662_v47 = vsel %vm2177_vm1, %v2167_v21, %v2163_v16  ;;  %v2219_v5 = vld [vmem:[%s2123_s16 + $0xc] sm:$0x1]  ;;  %v2231_v14 = vld [vmem:[%s2123_s16 + $0x4] sm:$0xf] }
  0x36   : > { %v624_v48 = vsel %vm2142_vm0, %v622_v22, %v623_v23  ;;  %v2196_v50 = vrot.slane %v1064_v27, 4  ;;  %v1113_v51 = vrot.slane %v1104_v36, 5  ;;  %v672_v54 = vsel %vm2177_vm1, %v663_v25, %v671_v32  ;;  %v749_v9 = vld [vmem:[%s2098_s8 + $0xc] sm:$0x1]  ;;  %v1037_v16 = vld [vmem:[%s2123_s16 + $0x8] sm:$0xf] }
  0x37   : > { %1025 = vrot.lane.b32.xlu1 %v1019_v44, %s1918_s10  ;;  %1023 = vrot.lane.b32.xlu0 %v1016_v45, %s1918_s10  ;;  %v1087_v44 = vshll.u32 %v1056_v28, 16  ;;  %v708_v45 = vrot.slane %v706_v35, 4  ;;  %v1738_v56 = vrot.slane %v1103_v39, 9  ;;  %v770_v58 = vshll.u32 %v748_v40, 16  ;;  %v2242_v18 = vld [vmem:[%s2123_s16] sm:$0x8] }
  0x38   : > { %v774_v59 = vshrl.u32 %v748_v40, 16  ;;  %v1080_v61 = vsel %vm2088_vm11, %v2181_v33, %v2170_v26  ;;  %v2211_v62 = vsel %vm2016_vm5, %v1732_v34, %v706_v35  ;;  %v673_v63 = vrot.slane %v671_v32, 4  ;;  %v799_v21 = vld [vmem:[%s2098_s8 + $0x8] sm:$0xf]  ;;  %v800_v27 = vld [vmem:[%s2098_s8 + $0xc] sm:$0x1] }
  0x39   : > { %v2214_v3 = vrot.slane %v1084_v43, 4  ;;  %v2216_v4 = vrot.slane %v1087_v44, 5  ;;  %v1733_v6 = vrot.slane %v797_v52, 9  ;;  %v807_v8 = vrot.slane %v798_v53, 5  ;;  %v1229_v35 = vld [vmem:[%s2123_s16 + $0x8] sm:$0xf] }
  0x3a   : > { %v1070_v10 = vsel %vm2088_vm11, %v2196_v50, %v2147_v57  ;;  %v1115_v12 = vrot.slane %v1113_v51, 4  ;;  %v1116_v13 = vrot.slane %v1105_v55, 5  ;;  %v2239_v17 = vsel %vm2025_vm7, %v1738_v56, %v1113_v51  ;;  %v859_v53 = vld [vmem:[%s2098_s8] sm:$0x8]  ;;  %v860_v55 = vld [vmem:[%s2098_s8 + $0x4] sm:$0xf] }
  0x3b   : > { %625 = vrot.lane.b32.xlu1 %v618_v1, %s1920_s19  ;;  %595 = vrot.lane.b32.xlu0 %v587_v2, %s1919_s18  ;;  %v681_v1 = vor.u32 %v680_v38, %v677_v37  ;;  %v699_v2 = vld [vmem:[%s2014_s13 + $0x10] sm:$0x7]  ;;  %v2244_v57 = vrot.slane %v770_v58, 5  ;;  %v2248_v19 = vsel %vm2025_vm7, %v1733_v6, %v807_v8  ;;  %v776_v20 = vrot.slane %v774_v59, 4  ;;  %v2270_v38 = vld [vmem:[%s2098_s8 + $0x4] sm:$0xf] }
  0x3c   : > { %v711_v23 = vrot.slane %v709_v46, 4  ;;  %v712_v24 = vrot.slane %v699_v2, 7  ;;  %v780_v25 = vshll.u32 %v749_v9, 16  ;;  %v1090_v28 = vsel %vm2088_vm11, %v2214_v3, %v2216_v4  ;;  %v1231_v6 = vld [vmem:[%s2123_s16 + $0x10] sm:$0x3] }
  0x3d   : > { %v2255_v22 = vsel %vm2177_vm1, %v673_v63, %v681_v1  ;;  %v1118_v29 = vrot.slane %v1116_v13, 4  ;;  %v777_v32 = vor.u32 %v776_v20, %v2244_v57  ;;  %v809_v34 = vrot.slane %v807_v8, 4  ;;  %v861_v8 = vld [vmem:[%s2098_s8 + $0x8] sm:$0xf]  ;;  %v2393_v4 = vld [vmem:[%s2123_s16 + $0x4] sm:$0xf] }
  0x3e   : > { %v1119_v36 = vrot.slane %v2219_v5, 5  ;;  %v1143_v37 = vrot.slane %v2231_v14, 7  ;;  %v2272_v39 = vrot.slane %v780_v25, 5  ;;  %v810_v40 = vrot.slane %v799_v21, 5  ;;  %v1259_v20 = vld [vmem:[%s2123_s16 + $0x8] sm:$0xf] }
  0x3f   : > { %1027 = vrot.lane.b32.xlu1 %v1022_v11, %s1918_s10  ;;  %627 = vrot.lane.b32.xlu0 %v621_v15, %s1920_s19  ;;  %v2228_v11 = vsel %vm2016_vm5, %v708_v45, %v709_v46  ;;  %v2234_v15 = vld [vmem:[%s2123_s16 + $0x8] sm:$0xf]  ;;  %v1739_v44 = vrot.slane %v2242_v18, 11  ;;  %v2277_v45 = vrot.slane %v777_v32, 4  ;;  %v813_v46 = vrot.slane %v800_v27, 5  ;;  %s1798_s10 = smul.u32 3, %s2820_s21 }
  0x40   : > { %v1146_v43 = vrot.slane %v2234_v15, 7  ;;  %v2288_v50 = vsel %vm2025_vm7, %v809_v34, %v810_v40  ;;  %v812_v51 = vrot.slane %v810_v40, 4  ;;  %v1238_v52 = vrot.slane %v1229_v35, 6  ;;  %v1260_v25 = vld [vmem:[%s2123_s16 + $0xc] sm:$0xf] }
  0x41   : > { %v2300_v63 = vsel %vm2016_vm5, %v711_v23, %v712_v24  ;;  %v760_v9 = vshll.u32 %v2270_v38, 16  ;;  %v2319_v21 = vsel %vm2025_vm7, %v1118_v29, %v1119_v36  ;;  %v2323_v23 = vrot.slane %v1143_v37, 4  ;;  %v1258_v35 = vld [vmem:[%s2123_s16 + $0x4] sm:$0xc]  ;;  %v1314_v31 = vld [vmem:[%s2123_s16 + $0xc] sm:$0xf] }
  0x42   : > { %v2304_v1 = vsel %vm2025_vm7, %v812_v51, %v813_v46  ;;  %v1240_v2 = vrot.slane %v1238_v52, 4  ;;  %v764_v27 = vshrl.u32 %v2270_v38, 16  ;;  %v878_v29 = vshrl.u32 %v861_v8, 16  ;;  %v407_v51 = vld [vmem:[%s2014_s13 + $0x8] sm:$0xf] }
  0x43   : > { %1043 = vrot.lane.b32.xlu1 %v1036_v30, %s1916_s17  ;;  %1041 = vrot.lane.b32.xlu0 %v1035_v41, %s1916_s17  ;;  %v2263_v30 = vld [vmem:[%s2098_s8] sm:$0xf]  ;;  %v1230_v41 = vld [vmem:[%s2123_s16 + $0xc] sm:$0xf]  ;;  %v881_v32 = vshll.u32 %v861_v8, 16  ;;  %v1272_v34 = vshrl.u32 %v1259_v20, 16 }
  0x44   : > { %v751_v56 = vshrl.u32 %v2263_v30, 16  ;;  %v754_v58 = vshll.u32 %v2263_v30, 16  ;;  %v1241_v59 = vrot.slane %v1230_v41, 6  ;;  %v1275_v46 = vshll.u32 %v1259_v20, 16  ;;  %411 = vst.msk [vmem:[#allocation2 + $0x10] sm:$0xf] %vm408_vm2, %v407_v51 }
  0x45   : > { %v1263_v8 = vshrl.u32 %v1258_v35, 16  ;;  %v2361_v20 = vrot.slane %v1146_v43, 4  ;;  %v2398_v30 = vrot.slane %v760_v9, 5 }
  0x46   : > { %v2327_v24 = vsel %vm2142_vm0, %v1240_v2, %v1241_v59  ;;  %v1243_v7 = vrot.slane %v1241_v59, 4  ;;  %v1285_v59 = vshll.u32 %v1260_v25, 16  ;;  %v406_v2 = vld [vmem:[%s2014_s13 + $0x4] sm:$0xf] }
  0x47   : > { %683 = vrot.lane.b32.xlu1 %v662_v47, %s1921_s20  ;;  %629 = vrot.lane.b32.xlu0 %v624_v48, %s1920_s19  ;;  %v1228_v47 = vld [vmem:[%s2123_s16 + $0x4] sm:$0xc]  ;;  %v2284_v48 = vsel %vm2025_vm7, %v1115_v12, %v1116_v13  ;;  %v864_v12 = vshrl.u32 %v859_v53, 16  ;;  %v869_v13 = vshrl.u32 %v860_v55, 16  ;;  %v1274_v53 = vrot.slane %v1272_v34, 6 }
  0x48   : > { %v1741_v5 = vrot.slane %v1228_v47, 10  ;;  %v405_v47 = vld [vmem:[%s2014_s13] sm:$0xf]  ;;  %410 = vst.msk [vmem:[#allocation2 + $0x8] sm:$0xf] %vm408_vm2, %v406_v2  ;;  %s1923_s13 = smov 72  }
  0x49   : > { %v2333_v33 = vrot.slane %v864_v12, 11  ;;  %v1266_v12 = vshll.u32 %v1258_v35, 16  ;;  %409 = vst.msk [vmem:[#allocation2] sm:$0xf] %vm408_vm2, %v405_v47  ;;  %v2386_v34 = vld [vmem:[%s2123_s16 + $0xc] sm:$0x7] }
  0x4a   : > { %v2331_v26 = vsel %vm2142_vm0, %v1741_v5, %v1238_v52  ;;  %v2350_v52 = vrot.slane %v878_v29, 7  ;;  %v2379_v29 = vrot.slane %v751_v56, 4  ;;  %v927_v2 = vld [vmem:[%s2098_s8 + $0x8] sm:$0xf]  ;;  %v1149_v14 = vrot.slane %v2386_v34, 7 }
  0x4b   : > { %1045 = vrot.lane.b32.xlu1 %v1037_v16, %s1916_s17  ;;  %685 = vrot.lane.b32.xlu0 %v672_v54, %s1921_s20  ;;  %v783_v54 = vsel %vm2088_vm11, %v2277_v45, %v2272_v39  ;;  %v872_v16 = vshll.u32 %v860_v55, 16  ;;  %s1922_s17 = smov 64   ;;  %v1282_v55 = vshrl.u32 %v1260_v25, 16  ;;  %v1261_v25 = vld [vmem:[%s2123_s16 + $0x10] sm:$0x7]  ;;  %vm530_vm7 = vcmask 257216  }
  0x4c   : > { %v1292_v47 = vshrl.u32 %v1261_v25, 16  ;;  %v1295_v51 = vshll.u32 %v1261_v25, 16  ;;  %v957_v25 = vld [vmem:[%s2098_s8 + $0x4] sm:$0xc]  ;;  %v1150_v49 = vsel %vm2016_vm5, %v2361_v20, %v1149_v14 }
  0x4d   : > { %v1210_v39 = vld [vmem:[%s2123_s16 + $0x4] sm:$0xf] }
  0x4f   : > { %1093 = vrot.lane.b32.xlu1 %v1080_v61, %s1915_s15  ;;  %1091 = vrot.lane.b32.xlu0 %v1070_v10, %s1915_s15  ;;  %v871_v61 = vrot.slane %v869_v13, 7  ;;  %v1244_v10 = vrot.slane %v1231_v6, 6  ;;  %v1277_v6 = vrot.slane %v1275_v46, 7  ;;  %v1284_v13 = vrot.slane %v1282_v55, 6 }
  0x51   : > { %v2338_v36 = vor.u32 %v872_v16, %v871_v61  ;;  %v2342_v40 = vsel %vm2142_vm0, %v1243_v7, %v1244_v10  ;;  %v876_v41 = vrot.slane %v871_v61, 4  ;;  %v862_v16 = vld [vmem:[%s2098_s8 + $0xc] sm:$0xf]  ;;  %v2363_v61 = vor.u32 %v1277_v6, %v1274_v53  ;;  %v958_v6 = vld [vmem:[%s2098_s8 + $0x8] sm:$0xf] }
  0x52   : > { %v1265_v7 = vrot.slane %v1263_v8, 6  ;;  %v1268_v10 = vrot.slane %v1266_v12, 7  ;;  %v887_v56 = vshrl.u32 %v862_v16, 16  ;;  %v890_v46 = vshll.u32 %v862_v16, 16  ;;  %v727_v8 = vld [vmem:[%s2098_s8] sm:$0xf] }
  0x53   : > { %714 = vrot.lane.b32.xlu1 %v2211_v62, %s1922_s17  ;;  %687 = vrot.lane.b32.xlu0 %v2255_v22, %s1921_s20  ;;  %v875_v5 = vsel %vm2075_vm10, %v2333_v33, %v2338_v36  ;;  %v883_v62 = vor.u32 %v881_v32, %v2350_v52  ;;  %v1287_v22 = vrot.slane %v1285_v59, 7  ;;  %v2383_v32 = vrot.slane %v754_v58, 5  ;;  %v2401_v58 = vld [vmem:[%s2123_s16 + $0x8] sm:$0xf] }
  0x54   : > { %v2410_v53 = vsel %vm2016_vm5, %v1739_v44, %v1143_v37  ;;  %v889_v59 = vrot.slane %v887_v56, 7  ;;  %v1294_v37 = vrot.slane %v1292_v47, 6  ;;  %v1297_v44 = vrot.slane %v1295_v51, 7 }
  0x55   : > { %v2390_v35 = vsel %vm2075_vm10, %v876_v41, %v883_v62  ;;  %v1288_v3 = vor.u32 %v1287_v22, %v1284_v13  ;;  %v885_v41 = vrot.slane %v2350_v52, 4  ;;  %v926_v52 = vld [vmem:[%s2098_s8 + $0x4] sm:$0xc]  ;;  %v757_v12 = vor.u32 %v2383_v32, %v2379_v29  ;;  %v959_v13 = vld [vmem:[%s2098_s8 + $0xc] sm:$0xf] }
  0x56   : > { %v2431_v62 = vrot.slane %v764_v27, 4  ;;  %v1173_v22 = vshrl.u32 %v2393_v4, 16  ;;  %v1298_v16 = vor.u32 %v1297_v44, %v1294_v37  ;;  %v1182_v29 = vshrl.u32 %v2401_v58, 16  ;;  %v929_v44 = vld [vmem:[%s2098_s8 + $0x10] sm:$0x3] }
  0x57   : > { %1095 = vrot.lane.b32.xlu1 %v1090_v28, %s1915_s15  ;;  %716 = vrot.lane.b32.xlu0 %v2228_v11, %s1922_s17  ;;  %v1280_v11 = vrot.slane %v2363_v61, 4  ;;  %v1269_v28 = vor.u32 %v1268_v10, %v1265_v7  ;;  %v1290_v18 = vrot.slane %v1288_v3, 4  ;;  %v1736_v7 = vrot.slane %v926_v52, 10  ;;  %s1924_s15 = smov 80  }
  0x58   : > { %v936_v10 = vrot.slane %v927_v2, 6  ;;  %v971_v27 = vshrl.u32 %v958_v6, 16  ;;  %v974_v32 = vshll.u32 %v958_v6, 16  ;;  %v962_v52 = vshrl.u32 %v957_v25, 16  ;;  %v1163_v6 = vld [vmem:[%s2123_s16] sm:$0x8] }
  0x59   : > { %v2414_v9 = vsel %vm2177_vm1, %v1280_v11, %v1288_v3  ;;  %v2416_v55 = vrot.slane %v1269_v28, 4  ;;  %v728_v3 = vld [vmem:[%s2098_s8 + $0x4] sm:$0xf]  ;;  %v1185_v11 = vshll.u32 %v2401_v58, 16  ;;  %v2452_v28 = vsel %vm2177_vm1, %v1290_v18, %v1298_v16 }
  0x5a   : > { %v2456_v56 = vsel %vm2142_vm0, %v1736_v7, %v936_v10  ;;  %v973_v47 = vrot.slane %v971_v27, 6  ;;  %v976_v51 = vrot.slane %v974_v32, 7  ;;  %v1147_v58 = vsel %vm2016_vm5, %v2323_v23, %v1146_v43 }
  0x5b   : > { %1123 = vrot.lane.b32.xlu1 %v2284_v48, %s1917_s9  ;;  %1121 = vrot.lane.b32.xlu0 %v2239_v17, %s1917_s9  ;;  %v1279_v17 = vsel %vm2177_vm1, %v2416_v55, %v2363_v61  ;;  %v892_v48 = vor.u32 %v890_v46, %v889_v59  ;;  %v981_v46 = vshrl.u32 %v959_v13, 16  ;;  %v984_v59 = vshll.u32 %v959_v13, 16  ;;  %v1866_v61 = vld [vmem:[%s2786_s4 + $0x58] sm:$0xff]   ;;  %v908_v55 = vld [vmem:[%s2098_s8 + $0x8] sm:$0xf] }
  0x5c   : > { %v767_v2 = vor.u32 %v2431_v62, %v2398_v30  ;;  %v965_v37 = vshll.u32 %v957_v25, 16  ;;  %v964_v16 = vrot.slane %v962_v52, 6  ;;  %v938_v13 = vrot.slane %v936_v10, 4 }
  0x5d   : > { %v2443_v38 = vsel %vm2075_vm10, %v885_v41, %v892_v48  ;;  %v928_v41 = vld [vmem:[%s2098_s8 + $0xc] sm:$0xf]  ;;  %v983_v18 = vrot.slane %v981_v46, 6  ;;  %v986_v48 = vrot.slane %v984_v59, 7  ;;  %v758_v15 = vrot.slane %v757_v12, 4 }
  0x5e   : > { %v1175_v7 = vrot.slane %v1173_v22, 7  ;;  %v967_v43 = vrot.slane %v965_v37, 7  ;;  %v939_v23 = vrot.slane %v928_v41, 6  ;;  %v942_v10 = vrot.slane %v929_v44, 6  ;;  %v729_v59 = vld [vmem:[%s2098_s8 + $0x8] sm:$0xf] }
  0x5f   : > { %733 = vrot.lane.b32.xlu1 %v727_v8, %s1923_s13  ;;  %718 = vrot.lane.b32.xlu0 %v2300_v63, %s1922_s17  ;;  %v960_v63 = vld [vmem:[%s2098_s8 + $0x10] sm:$0x7]  ;;  %v977_v8 = vor.u32 %v976_v51, %v973_v47  ;;  %v987_v62 = vor.u32 %v986_v48, %v983_v18  ;;  %v1184_v41 = vrot.slane %v1182_v29, 7  ;;  %v1168_v52 = vshrl.u32 %v1163_v6, 16 }
  0x60   : > { %v991_v32 = vshrl.u32 %v960_v63, 16  ;;  %v994_v25 = vshll.u32 %v960_v63, 16  ;;  %v968_v46 = vor.u32 %v967_v43, %v964_v16  ;;  %v2474_v47 = vsel %vm2142_vm0, %v938_v13, %v939_v23 }
  0x61   : > { %v979_v27 = vrot.slane %v977_v8, 4  ;;  %v941_v51 = vrot.slane %v939_v23, 4  ;;  %v989_v12 = vrot.slane %v987_v62, 4  ;;  %v763_v37 = vsel %vm2088_vm11, %v758_v15, %v2398_v30  ;;  %v1857_v23 = vld [vmem:[%s2786_s4 + $0x30] sm:$0xff]  }
  0x62   : > { %v993_v22 = vrot.slane %v991_v32, 6  ;;  %v969_v63 = vrot.slane %v968_v46, 4  ;;  %v768_v44 = vrot.slane %v767_v2, 4  ;;  %v1176_v48 = vshll.u32 %v2393_v4, 16  ;;  %v829_v32 = vld [vmem:[%s2098_s8 + $0x4] sm:$0xf] }
  0x63   : > { %1125 = vrot.lane.b32.xlu1 %v2319_v21, %s1917_s9  ;;  %735 = vrot.lane.b32.xlu0 %v728_v3, %s1923_s13  ;;  %v988_v21 = vsel %vm2177_vm1, %v979_v27, %v987_v62  ;;  %v996_v3 = vrot.slane %v994_v25, 7  ;;  %v2485_v18 = vsel %vm2142_vm0, %v941_v51, %v942_v10  ;;  %v1180_v4 = vrot.slane %v1175_v7, 4  ;;  %v828_v62 = vld [vmem:[%s2098_s8] sm:$0x8]  ;;  %v830_v25 = vld [vmem:[%s2098_s8 + $0x8] sm:$0xf] }
  0x64   : > { %1003 = vst.msk [vmem:[#allocation2 + $0xc] sm:$0xf] %vm408_vm2, %v988_v21  ;;  %v1187_v30 = vor.u32 %v1185_v11, %v1184_v41  ;;  %v773_v2 = vsel %vm2088_vm11, %v768_v44, %v2244_v57  ;;  %v1740_v6 = vrot.slane %v1168_v52, 11  ;;  %v1856_v57 = vld [vmem:[%s2786_s4 + $0x38] sm:$0xff]   ;;  %v1189_v15 = vrot.slane %v1184_v41, 4  ;;  %v1862_v52 = vld [vmem:[%s2786_s4 + $0x8] sm:$0xff]  }
  0x65   : > { %v997_v16 = vor.u32 %v996_v3, %v993_v22  ;;  %v1925_v43 = vmov 0   ;;  %v1734_v45 = vrot.slane %v828_v62, 11  ;;  %v841_v10 = vrot.slane %v830_v25, 7  ;;  %v1212_v21 = vld [vmem:[%s2123_s16 + $0xc] sm:$0xf] }
  0x66   : > { %v1188_v34 = vsel %vm2075_vm10, %v1180_v4, %v1187_v30  ;;  %1508 = vmatprep.subr.bf16.mxu0 %v1925_v43  ;;  %1766 = vmatprep.subr.bf16.mxu1 %v1925_v43  ;;  %v831_v22 = vld [vmem:[%s2098_s8 + $0xc] sm:$0x7]  ;;  %v1506_v36 = vsel %vm1504_vm3, %v1864_v42, 0  ;;  %vm723_vm11 = vcmask 585216   ;;  %vm903_vm0 = vcmask 913216  }
  0x67   : > { %1153 = vrot.lane.b32.xlu1 %v1147_v58, %s1919_s18  ;;  %1151 = vrot.lane.b32.xlu0 %v2410_v53, %s1919_s18  ;;  %v1166_v58 = vld [vmem:[%s2123_s16 + $0xc] sm:$0xf]  ;;  %v978_v53 = vsel %vm2177_vm1, %v969_v63, %v977_v8  ;;  %v998_v29 = vsel %vm2177_vm1, %v989_v12, %v997_v16  ;;  %v1178_v8 = vor.u32 %v1176_v48, %v1175_v7  ;;  %v843_v3 = vrot.slane %v841_v10, 4 }
  0x68   : > { %1002 = vst.msk [vmem:[#allocation2 + $0x4] sm:$0xf] %vm408_vm2, %v978_v53  ;;  %1004 = vst.msk [vmem:[#allocation2 + $0x14] sm:$0xf] %vm408_vm2, %v998_v29  ;;  %v1191_v13 = vshrl.u32 %v1166_v58, 16  ;;  %v1194_v11 = vshll.u32 %v1166_v58, 16  ;;  %1509 = vmatpush1.bf16.msra.mxu0 %v1856_v57  ;;  %1780 = vmatpush1.bf16.msra.mxu1 %v1856_v57 }
  0x69   : > { %v1179_v20 = vsel %vm2075_vm10, %v1740_v6, %v1178_v8  ;;  %1510 = vmatprep.subr.bf16.mxu0 %v1925_v43  ;;  %1767 = vmatprep.subr.bf16.mxu1 %v1925_v43  ;;  %v844_v41 = vrot.slane %v831_v22, 7  ;;  %v1313_v58 = vld [vmem:[%s2123_s16 + $0x8] sm:$0xf]  ;;  %v1312_v29 = vld [vmem:[%s2123_s16 + $0x4] sm:$0x8]  ;;  %vm922_vm1 = vcmask 978816  }
  0x6a   : > { %v1193_v14 = vrot.slane %v1191_v13, 7  ;;  %v1322_v16 = vrot.slane %v1313_v58, 7  ;;  %v1742_v4 = vrot.slane %v1312_v29, 11  ;;  %vm953_vm2 = vcmask 1044416  }
  0x6b   : > { %784 = vrot.lane.b32.xlu1 %v763_v37, %s1924_s15  ;;  %737 = vrot.lane.b32.xlu0 %v729_v59, %s1923_s13  ;;  %v1860_v59 = vld [vmem:[%s2786_s4 + $0x18] sm:$0xff]   ;;  %v845_v37 = vsel %vm2016_vm5, %v843_v3, %v844_v41  ;;  %vm1357_vm3 = vcmask 749248  }
  0x6c   : > { %v1196_v7 = vor.u32 %v1194_v11, %v1193_v14  ;;  %1511 = vmatpush1.bf16.msra.mxu0 %v1857_v23  ;;  %1781 = vmatpush1.bf16.msra.mxu1 %v1857_v23  ;;  %v1323_v8 = vsel %vm2016_vm5, %v1742_v4, %v1322_v16  ;;  %v909_v14 = vld [vmem:[%s2098_s8 + $0xc] sm:$0xf]  ;;  %v1869_v23 = vld [vmem:[%s2786_s4 + $0x40] sm:$0xff]  }
  0x6d   : > { %1512 = vmatprep.subr.bf16.mxu0 %v1925_v43  ;;  %1768 = vmatprep.subr.bf16.mxu1 %v1925_v43 }
  0x6e   : > { %v1197_v27 = vsel %vm2075_vm10, %v1189_v15, %v1196_v7  ;;  %vm634_vm10 = vcmask 454016  }
  0x6f   : > { %1155 = vrot.lane.b32.xlu1 %v1150_v49, %s1919_s18  ;;  %786 = vrot.lane.b32.xlu0 %v773_v2, %s1924_s15  ;;  %s1927_s18 = smov 96   ;;  %v1325_v49 = vrot.slane %v1314_v31, 7 }
  0x70   : > { %1513 = vmatpush1.bf16.msra.mxu0 %v1858_v60  ;;  %1782 = vmatpush1.bf16.msra.mxu1 %v1858_v60 }
  0x71   : > { %1514 = vmatprep.subr.bf16.mxu0 %v1925_v43  ;;  %1769 = vmatprep.subr.bf16.mxu1 %v1925_v43  ;;  %v1327_v11 = vrot.slane %v1325_v49, 4 }
  0x73   : > { %1200 = vrot.lane.b32.xlu1 %v1188_v34, %s1920_s19  ;;  %1198 = vrot.lane.b32.xlu0 %v1179_v20, %s1920_s19  ;;  %v1315_v34 = vld [vmem:[%s2123_s16 + $0x10] sm:$0x7]  ;;  %v1868_v20 = vld [vmem:[%s2786_s4 + $0x48] sm:$0xff]  }
  0x74   : > { %v1328_v57 = vrot.slane %v1315_v34, 7 }
  0x77   : > { %815 = vrot.lane.b32.xlu1 %v2248_v19, %s1926_s7  ;;  %788 = vrot.lane.b32.xlu0 %v783_v54, %s1924_s15  ;;  %v1211_v19 = vld [vmem:[%s2123_s16 + $0x8] sm:$0xf]  ;;  %v838_v54 = vrot.slane %v829_v32, 7 }
  0x79   : > { %v839_v46 = vsel %vm2016_vm5, %v1734_v45, %v838_v54  ;;  %v840_v51 = vrot.slane %v838_v54, 4 }
  0x7b   : > { %1202 = vrot.lane.b32.xlu1 %v1197_v27, %s1920_s19  ;;  %817 = vrot.lane.b32.xlu0 %v2288_v50, %s1926_s7  ;;  %v1859_v50 = vld [vmem:[%s2786_s4 + $0x20] sm:$0xff]   ;;  %v842_v12 = vsel %vm2016_vm5, %v840_v51, %v841_v10  ;;  %v1329_v27 = vsel %vm2016_vm5, %v1327_v11, %v1328_v57 }
  0x7c   : > { %1515 = vmatpush1.bf16.msra.mxu0 %v1859_v50  ;;  %1783 = vmatpush1.bf16.msra.mxu1 %v1859_v50 }
  0x7d   : > { %1516 = vmatprep.subr.bf16.mxu0 %v1925_v43  ;;  %1770 = vmatprep.subr.bf16.mxu1 %v1925_v43 }
  0x7f   : > { %1218 = vrot.lane.b32.xlu1 %v1211_v19, %s1921_s20  ;;  %1216 = vrot.lane.b32.xlu0 %v1210_v39, %s1921_s20 }
  0x80   : > { %1517 = vmatpush1.bf16.msra.mxu0 %v1860_v59  ;;  %1784 = vmatpush1.bf16.msra.mxu1 %v1860_v59 }
  0x81   : > { %1518 = vmatprep.subr.bf16.mxu0 %v1925_v43  ;;  %1771 = vmatprep.subr.bf16.mxu1 %v1925_v43 }
  0x83   : > { %846 = vrot.lane.b32.xlu1 %v839_v46, %s1927_s18  ;;  %819 = vrot.lane.b32.xlu0 %v2304_v1, %s1926_s7  ;;  %v1861_v1 = vld [vmem:[%s2786_s4 + $0x10] sm:$0xff]  }
  0x84   : > { %1519 = vmatpush1.bf16.msra.mxu0 %v1861_v1  ;;  %1785 = vmatpush1.bf16.msra.mxu1 %v1861_v1 }
  0x85   : > { %1520 = vmatprep.subr.bf16.mxu0 %v1925_v43  ;;  %1772 = vmatprep.subr.bf16.mxu1 %v1925_v43 }
  0x87   : > { %1220 = vrot.lane.b32.xlu1 %v1212_v21, %s1921_s20  ;;  %848 = vrot.lane.b32.xlu0 %v842_v12, %s1927_s18  ;;  %s1799_s20 = smul.u32 12, %s2814_s22 }
  0x88   : > { %1521 = vmatpush1.bf16.msra.mxu0 %v1862_v52  ;;  %1786 = vmatpush1.bf16.msra.mxu1 %v1862_v52 }
  0x89   : > { %1522 = vmatprep.subr.bf16.mxu0 %v1925_v43  ;;  %1773 = vmatprep.subr.bf16.mxu1 %v1925_v43  ;;  %s2672_s21 = sadd.s32 %s1799_s20, %s1798_s10 }
  0x8a   : > { %s1726_s16 = sshll.u32 %s2672_s21, 2 }
  0x8b   : > { %1248 = vrot.lane.b32.xlu1 %v2327_v24, %s1922_s17  ;;  %1246 = vrot.lane.b32.xlu0 %v2331_v26, %s1922_s17  ;;  %v1863_v24 = vld [vmem:[%s2786_s4] sm:$0xff]  }
  0x8c   : > { %v522_v63 = vpop.permute.xlu0 %521  ;;  %1523 = vmatpush1.bf16.msra.mxu0 %v1863_v24  ;;  %1787 = vmatpush1.bf16.msra.mxu1 %v1863_v24 }
  0x8d   : > { %v488_v44 = vpop.permute.xlu1 %487  ;;  %1528 = vmatprep.subr.bf16.mxu0 %v1925_v43  ;;  %1774 = vmatprep.subr.bf16.mxu1 %v1925_v43 }
  0x8f   : > { %894 = vrot.lane.b32.xlu1 %v875_v5, %s1928_s11  ;;  %850 = vrot.lane.b32.xlu0 %v845_v37, %s1927_s18  ;;  %s394_s18 = scalar_lea.vmem %s2785_s3, %s1726_s16 }
  0x90   : > { %v490_v26 = vpop.permute.xlu0 %489  ;;  %1529 = vmatpush2.bf16.msra.mxu0 %v1506_v36  ;;  %1788 = vmatpush2.bf16.msra.mxu1 %v1506_v36  ;;  %v1342_v0 = vld [vmem:[%s394_s18] sm:$0xf]  ;;  %v1344_v19 = vld [vmem:[%s394_s18 + $0x8] sm:$0xf] }
  0x91   : > { %v492_v48 = vpop.permute.xlu1 %491  ;;  %1530 = vmatprep.subr.bf16.mxu0 %v1925_v43  ;;  %1775 = vmatprep.subr.bf16.mxu1 %v1925_v43 }
  0x93   : > { %1250 = vrot.lane.b32.xlu1 %v2342_v40, %s1922_s17  ;;  %896 = vrot.lane.b32.xlu0 %v2390_v35, %s1928_s11  ;;  %v1865_v40 = vld [vmem:[%s2786_s4 + $0x60] sm:$0xff]  }
  0x94   : > { %v526_v33 = vpop.permute.xlu0 %525  ;;  %v907_v35 = vld [vmem:[%s2098_s8 + $0x4] sm:$0xf]  ;;  %1531 = vmatpush2.bf16.msra.mxu0 %v1865_v40  ;;  %1789 = vmatpush2.bf16.msra.mxu1 %v1865_v40  ;;  %s1930_s8 = smov 120  }
  0x95   : > { %v524_v5 = vpop.permute.xlu1 %523  ;;  %1532 = vmatprep.subr.bf16.mxu0 %v1925_v43  ;;  %1776 = vmatprep.subr.bf16.mxu1 %v1925_v43 }
  0x97   : > { %1302 = vrot.lane.b32.xlu1 %v2414_v9, %s1923_s13  ;;  %1300 = vrot.lane.b32.xlu0 %v1279_v17, %s1923_s13  ;;  %v1324_v17 = vrot.slane %v1322_v16, 4 }
  0x98   : > { %1533 = vmatpush2.bf16.msra.mxu0 %v1866_v61  ;;  %1790 = vmatpush2.bf16.msra.mxu1 %v1866_v61 }
  0x99   : > { %v573_v53 = vpop.permute.xlu1 %572  ;;  %v454_v9 = vpop.permute.xlu0 %453  ;;  %1534 = vmatprep.subr.bf16.mxu0 %v1925_v43  ;;  %1777 = vmatprep.subr.bf16.mxu1 %v1925_v43  ;;  %v1326_v6 = vsel %vm2016_vm5, %v1324_v17, %v1325_v49  ;;  %vm692_vm5 = vcmask 519616  }
  0x9a   : > { %463 = vst.msk [vmem:[#allocation2] sm:$0xf] %vm462_vm4, %v454_v9 }
  0x9b   : > { %497 = vst.msk [vmem:[#allocation2] sm:$0xf] %vm496_vm6, %v488_v44  ;;  %913 = vrot.lane.b32.xlu1 %v907_v35, %s1929_s28  ;;  %898 = vrot.lane.b32.xlu0 %v2443_v38, %s1928_s11  ;;  %v1867_v38 = vld [vmem:[%s2786_s4 + $0x50] sm:$0xff]  }
  0x9c   : > { %531 = vst.msk [vmem:[#allocation2] sm:$0xf] %vm530_vm7, %v522_v63  ;;  %1535 = vmatpush2.bf16.msra.mxu0 %v1867_v38  ;;  %1791 = vmatpush2.bf16.msra.mxu1 %v1867_v38 }
  0x9d   : > { %v458_v30 = vpop.permute.xlu1 %457  ;;  %v456_v2 = vpop.permute.xlu0 %455  ;;  %582 = vst.msk [vmem:[#allocation2] sm:$0xf] %vm581_vm8, %v573_v53  ;;  %1536 = vmatprep.subr.bf16.mxu0 %v1925_v43  ;;  %1778 = vmatprep.subr.bf16.mxu1 %v1925_v43 }
  0x9e   : > { %465 = vst.msk [vmem:[#allocation2 + $0x10] sm:$0xf] %vm462_vm4, %v458_v30  ;;  %464 = vst.msk [vmem:[#allocation2 + $0x8] sm:$0xf] %vm462_vm4, %v456_v2 }
  0x9f   : > { %499 = vst.msk [vmem:[#allocation2 + $0x10] sm:$0xf] %vm496_vm6, %v492_v48  ;;  %498 = vst.msk [vmem:[#allocation2 + $0x8] sm:$0xf] %vm496_vm6, %v490_v26  ;;  %1304 = vrot.lane.b32.xlu1 %v2452_v28, %s1923_s13  ;;  %915 = vrot.lane.b32.xlu0 %v908_v55, %s1929_s28 }
  0xa0   : > { %533 = vst.msk [vmem:[#allocation2 + $0x10] sm:$0xf] %vm530_vm7, %v526_v33  ;;  %532 = vst.msk [vmem:[#allocation2 + $0x8] sm:$0xf] %vm530_vm7, %v524_v5  ;;  %1537 = vmatpush2.bf16.msra.mxu0 %v1868_v20  ;;  %1792 = vmatpush2.bf16.msra.mxu1 %v1868_v20 }
  0xa1   : > { %v577_v13 = vpop.permute.xlu1 %576  ;;  %v575_v28 = vpop.permute.xlu0 %574  ;;  %1538 = vmatprep.subr.bf16.mxu0 %v1925_v43  ;;  %1779 = vmatprep.subr.bf16.mxu1 %v1925_v43 }
  0xa2   : > { %584 = vst.msk [vmem:[#allocation2 + $0x10] sm:$0xf] %vm581_vm8, %v577_v13  ;;  %583 = vst.msk [vmem:[#allocation2 + $0x8] sm:$0xf] %vm581_vm8, %v575_v28 }
  0xa3   : > { %1332 = vrot.lane.b32.xlu1 %v1326_v6, %s1924_s15  ;;  %1330 = vrot.lane.b32.xlu0 %v1323_v8, %s1924_s15 }
  0xa4   : > { %1539 = vmatpush2.bf16.msra.mxu0 %v1869_v23  ;;  %1793 = vmatpush2.bf16.msra.mxu1 %v1869_v23 }
  0xa5   : > { %v594_v15 = vpop.permute.xlu1 %593  ;;  %v592_v7 = vpop.permute.xlu0 %591 }
  0xa6   : > { %602 = vst.msk [vmem:[#allocation2 + $0x8] sm:$0xf] %vm600_vm9, %v594_v15  ;;  %601 = vst.msk [vmem:[#allocation2] sm:$0xf] %vm600_vm9, %v592_v7 }
  0xa7   : > { %944 = vrot.lane.b32.xlu1 %v2456_v56, %s1930_s8  ;;  %917 = vrot.lane.b32.xlu0 %v909_v14, %s1929_s28  ;;  %v1343_v56 = vld [vmem:[%s394_s18 + $0x4] sm:$0xf] }
  0xa9   : > { %v1026_v62 = vpop.permute.xlu1 %1025  ;;  %v1024_v32 = vpop.permute.xlu0 %1023 }
  0xaa   : > { %1033 = vst.msk [vmem:[#allocation2 + $0xc] sm:$0xf] %vm462_vm4, %v1026_v62  ;;  %1032 = vst.msk [vmem:[#allocation2 + $0x4] sm:$0xf] %vm462_vm4, %v1024_v32 }
  0xab   : > { %1334 = vrot.lane.b32.xlu1 %v1329_v27, %s1924_s15  ;;  %946 = vrot.lane.b32.xlu0 %v2474_v47, %s1930_s8  ;;  %s1727_s15 = sshll.u32 %s2672_s21, 3 }
  0xac   : > { %s403_s20 = scalar_lea.vmem %s2788_s6, %s1727_s15 }
  0xad   : > { %v626_v43 = vpop.permute.xlu1 %625  ;;  %v596_v60 = vpop.permute.xlu0 %595 }
  0xae   : > { %635 = vst.msk [vmem:[#allocation2] sm:$0xf] %vm634_vm10, %v626_v43 }
  0xaf   : > { %603 = vst.msk [vmem:[#allocation2 + $0x10] sm:$0xf] %vm600_vm9, %v596_v60  ;;  %1350 = vrot.lane.b32.xlu1 %v1343_v56, %s1926_s7  ;;  %1348 = vrot.lane.b32.xlu0 %v1342_v0, %s1926_s7 }
  0xb1   : > { %v1028_v39 = vpop.permute.xlu1 %1027  ;;  %v628_v45 = vpop.permute.xlu0 %627 }
  0xb2   : > { %1034 = vst.msk [vmem:[#allocation2 + $0x14] sm:$0xf] %vm462_vm4, %v1028_v39  ;;  %vm1497_vm4 = vcmask 752640  }
  0xb3   : > { %636 = vst.msk [vmem:[#allocation2 + $0x8] sm:$0xf] %vm634_vm10, %v628_v45  ;;  %1352 = vrot.lane.b32.xlu1 %v1344_v19, %s1926_s7  ;;  %948 = vrot.lane.b32.xlu0 %v2485_v18, %s1930_s8  ;;  %v1743_v45 = vld [vmem:[%s2787_s5] ss:$0 sm:$0xff] }
  0xb5   : > { %v1044_v47 = vpop.permute.xlu1 %1043  ;;  %v1042_v54 = vpop.permute.xlu0 %1041 }
  0xb6   : > { %1051 = vst.msk [vmem:[#allocation2 + $0xc] sm:$0xf] %vm496_vm6, %v1044_v47  ;;  %1050 = vst.msk [vmem:[#allocation2 + $0x4] sm:$0xf] %vm496_vm6, %v1042_v54 }
  0xb9   : > { %v684_v25 = vpop.permute.xlu1 %683  ;;  %v630_v50 = vpop.permute.xlu0 %629 }
  0xba   : > { %693 = vst.msk [vmem:[#allocation2] sm:$0xf] %vm692_vm5, %v684_v25 }
  0xbb   : > { %637 = vst.msk [vmem:[#allocation2 + $0x10] sm:$0xf] %vm634_vm10, %v630_v50 }
  0xbd   : > { %v1046_v46 = vpop.permute.xlu1 %1045  ;;  %v686_v51 = vpop.permute.xlu0 %685 }
  0xbe   : > { %1052 = vst.msk [vmem:[#allocation2 + $0x14] sm:$0xf] %vm496_vm6, %v1046_v46  ;;  %vm1556_vm6 = vcmask 64512  }
  0xbf   : > { %694 = vst.msk [vmem:[#allocation2 + $0x8] sm:$0xf] %vm692_vm5, %v686_v51 }
  0xc1   : > { %v1094_v18 = vpop.permute.xlu1 %1093  ;;  %v1092_v10 = vpop.permute.xlu0 %1091 }
  0xc2   : > { %1101 = vst.msk [vmem:[#allocation2 + $0xc] sm:$0xf] %vm530_vm7, %v1094_v18  ;;  %1100 = vst.msk [vmem:[#allocation2 + $0x4] sm:$0xf] %vm530_vm7, %v1092_v10 }
  0xc5   : > { %v715_v59 = vpop.permute.xlu1 %714  ;;  %v688_v21 = vpop.permute.xlu0 %687 }
  0xc6   : > { %724 = vst.msk [vmem:[#allocation2] sm:$0xf] %vm723_vm11, %v715_v59 }
  0xc7   : > { %695 = vst.msk [vmem:[#allocation2 + $0x10] sm:$0xf] %vm692_vm5, %v688_v21 }
  0xc9   : > { %v1096_v12 = vpop.permute.xlu1 %1095  ;;  %v717_v22 = vpop.permute.xlu0 %716 }
  0xca   : > { %1102 = vst.msk [vmem:[#allocation2 + $0x14] sm:$0xf] %vm530_vm7, %v1096_v12 }
  0xcb   : > { %725 = vst.msk [vmem:[#allocation2 + $0x8] sm:$0xf] %vm723_vm11, %v717_v22 }
  0xcd   : > { %v1124_v1 = vpop.permute.xlu1 %1123  ;;  %v1122_v3 = vpop.permute.xlu0 %1121 }
  0xce   : > { %1131 = vst.msk [vmem:[#allocation2 + $0xc] sm:$0xf] %vm581_vm8, %v1124_v1  ;;  %1130 = vst.msk [vmem:[#allocation2 + $0x4] sm:$0xf] %vm581_vm8, %v1122_v3 }
  0xd1   : > { %v734_v41 = vpop.permute.xlu1 %733  ;;  %v719_v52 = vpop.permute.xlu0 %718 }
  0xd2   : > { %743 = vst.msk [vmem:[#allocation2] sm:$0xf] %vm742_vm12, %v734_v41 }
  0xd3   : > { %726 = vst.msk [vmem:[#allocation2 + $0x10] sm:$0xf] %vm723_vm11, %v719_v52 }
  0xd5   : > { %v1126_v63 = vpop.permute.xlu1 %1125  ;;  %v736_v37 = vpop.permute.xlu0 %735 }
  0xd6   : > { %1132 = vst.msk [vmem:[#allocation2 + $0x14] sm:$0xf] %vm581_vm8, %v1126_v63 }
  0xd7   : > { %744 = vst.msk [vmem:[#allocation2 + $0x8] sm:$0xf] %vm742_vm12, %v736_v37 }
  0xd9   : > { %v1154_v44 = vpop.permute.xlu1 %1153  ;;  %v1152_v24 = vpop.permute.xlu0 %1151 }
  0xda   : > { %1161 = vst.msk [vmem:[#allocation2 + $0xc] sm:$0xf] %vm600_vm9, %v1154_v44  ;;  %1160 = vst.msk [vmem:[#allocation2 + $0x4] sm:$0xf] %vm600_vm9, %v1152_v24 }
  0xdd   : > { %v785_v26 = vpop.permute.xlu1 %784  ;;  %v738_v48 = vpop.permute.xlu0 %737 }
  0xde   : > { %794 = vst.msk [vmem:[#allocation2] sm:$0xf] %vm793_vm13, %v785_v26 }
  0xdf   : > { %745 = vst.msk [vmem:[#allocation2 + $0x10] sm:$0xf] %vm742_vm12, %v738_v48 }
  0xe1   : > { %v1156_v42 = vpop.permute.xlu1 %1155  ;;  %v787_v33 = vpop.permute.xlu0 %786 }
  0xe2   : > { %1162 = vst.msk [vmem:[#allocation2 + $0x14] sm:$0xf] %vm600_vm9, %v1156_v42 }
  0xe3   : > { %795 = vst.msk [vmem:[#allocation2 + $0x8] sm:$0xf] %vm793_vm13, %v787_v33 }
  0xe5   : > { %v1201_v36 = vpop.permute.xlu1 %1200  ;;  %v1199_v5 = vpop.permute.xlu0 %1198 }
  0xe6   : > { %1208 = vst.msk [vmem:[#allocation2 + $0xc] sm:$0xf] %vm634_vm10, %v1201_v36  ;;  %1207 = vst.msk [vmem:[#allocation2 + $0x4] sm:$0xf] %vm634_vm10, %v1199_v5 }
  0xe9   : > { %v816_v58 = vpop.permute.xlu1 %815  ;;  %v789_v40 = vpop.permute.xlu0 %788 }
  0xea   : > { %825 = vst.msk [vmem:[#allocation2] sm:$0xf] %vm824_vm14, %v816_v58 }
  0xeb   : > { %796 = vst.msk [vmem:[#allocation2 + $0x10] sm:$0xf] %vm793_vm13, %v789_v40 }
  0xed   : > { %v1203_v35 = vpop.permute.xlu1 %1202  ;;  %v818_v16 = vpop.permute.xlu0 %817 }
  0xee   : > { %1209 = vst.msk [vmem:[#allocation2 + $0x14] sm:$0xf] %vm634_vm10, %v1203_v35 }
  0xef   : > { %826 = vst.msk [vmem:[#allocation2 + $0x8] sm:$0xf] %vm824_vm14, %v818_v16 }
  0xf1   : > { %v1219_v53 = vpop.permute.xlu1 %1218  ;;  %v1217_v9 = vpop.permute.xlu0 %1216 }
  0xf2   : > { %1226 = vst.msk [vmem:[#allocation2 + $0xc] sm:$0xf] %vm692_vm5, %v1219_v53  ;;  %1225 = vst.msk [vmem:[#allocation2 + $0x4] sm:$0xf] %vm692_vm5, %v1217_v9 }
  0xf5   : > { %v847_v31 = vpop.permute.xlu1 %846  ;;  %v820_v29 = vpop.permute.xlu0 %819 }
  0xf6   : > { %856 = vst.msk [vmem:[#allocation2] sm:$0xf] %vm855_vm15, %v847_v31 }
  0xf7   : > { %827 = vst.msk [vmem:[#allocation2 + $0x10] sm:$0xf] %vm824_vm14, %v820_v29 }
  0xf9   : > { %v1221_v61 = vpop.permute.xlu1 %1220  ;;  %v849_v55 = vpop.permute.xlu0 %848 }
  0xfa   : > { %1227 = vst.msk [vmem:[#allocation2 + $0x14] sm:$0xf] %vm692_vm5, %v1221_v61 }
  0xfb   : > { %857 = vst.msk [vmem:[#allocation2 + $0x8] sm:$0xf] %vm855_vm15, %v849_v55 }
  0xfd   : > { %v1249_v17 = vpop.permute.xlu1 %1248  ;;  %v1247_v49 = vpop.permute.xlu0 %1246 }
  0xfe   : > { %1256 = vst.msk [vmem:[#allocation2 + $0xc] sm:$0xf] %vm723_vm11, %v1249_v17  ;;  %1255 = vst.msk [vmem:[#allocation2 + $0x4] sm:$0xf] %vm723_vm11, %v1247_v49 }
 0x101   : > { %v895_v4 = vpop.permute.xlu1 %894  ;;  %v851_v30 = vpop.permute.xlu0 %850 }
 0x102   : > { %904 = vst.msk [vmem:[#allocation2] sm:$0xf] %vm903_vm0, %v895_v4 }
 0x103   : > { %858 = vst.msk [vmem:[#allocation2 + $0x10] sm:$0xf] %vm855_vm15, %v851_v30 }
 0x105   : > { %v1251_v2 = vpop.permute.xlu1 %1250  ;;  %v897_v38 = vpop.permute.xlu0 %896 }
 0x106   : > { %1257 = vst.msk [vmem:[#allocation2 + $0x14] sm:$0xf] %vm723_vm11, %v1251_v2 }
 0x107   : > { %905 = vst.msk [vmem:[#allocation2 + $0x8] sm:$0xf] %vm903_vm0, %v897_v38 }
 0x109   : > { %v1303_v6 = vpop.permute.xlu1 %1302  ;;  %v1301_v8 = vpop.permute.xlu0 %1300 }
 0x10a   : > { %1310 = vst.msk [vmem:[#allocation2 + $0xc] sm:$0xf] %vm742_vm12, %v1303_v6  ;;  %1309 = vst.msk [vmem:[#allocation2 + $0x4] sm:$0xf] %vm742_vm12, %v1301_v8 }
 0x10d   : > { %v914_v13 = vpop.permute.xlu1 %913  ;;  %v899_v28 = vpop.permute.xlu0 %898 }
 0x10e   : > { %923 = vst.msk [vmem:[#allocation2] sm:$0xf] %vm922_vm1, %v914_v13 }
 0x10f   : > { %906 = vst.msk [vmem:[#allocation2 + $0x10] sm:$0xf] %vm903_vm0, %v899_v28 }
 0x111   : > { %v1305_v34 = vpop.permute.xlu1 %1304  ;;  %v916_v20 = vpop.permute.xlu0 %915 }
 0x112   : > { %1311 = vst.msk [vmem:[#allocation2 + $0x14] sm:$0xf] %vm742_vm12, %v1305_v34 }
 0x113   : > { %924 = vst.msk [vmem:[#allocation2 + $0x8] sm:$0xf] %vm922_vm1, %v916_v20 }
 0x115   : > { %v1333_v14 = vpop.permute.xlu1 %1332  ;;  %v1331_v11 = vpop.permute.xlu0 %1330 }
 0x116   : > { %1340 = vst.msk [vmem:[#allocation2 + $0xc] sm:$0xf] %vm793_vm13, %v1333_v14  ;;  %1339 = vst.msk [vmem:[#allocation2 + $0x4] sm:$0xf] %vm793_vm13, %v1331_v11 }
 0x119   : > { %v945_v57 = vpop.permute.xlu1 %944  ;;  %v918_v15 = vpop.permute.xlu0 %917 }
 0x11a   : > { %954 = vst.msk [vmem:[#allocation2] sm:$0xf] %vm953_vm2, %v945_v57 }
 0x11b   : > { %925 = vst.msk [vmem:[#allocation2 + $0x10] sm:$0xf] %vm922_vm1, %v918_v15 }
 0x11d   : > { %v1335_v7 = vpop.permute.xlu1 %1334  ;;  %v947_v23 = vpop.permute.xlu0 %946 }
 0x11e   : > { %1341 = vst.msk [vmem:[#allocation2 + $0x14] sm:$0xf] %vm793_vm13, %v1335_v7 }
 0x11f   : > { %955 = vst.msk [vmem:[#allocation2 + $0x8] sm:$0xf] %vm953_vm2, %v947_v23 }
 0x121   : > { %v1351_v27 = vpop.permute.xlu1 %1350  ;;  %v1349_v62 = vpop.permute.xlu0 %1348 }
 0x122   : > { %1359 = vst.msk [vmem:[#allocation2 + $0xc] sm:$0xf] %vm1357_vm3, %v1351_v27  ;;  %1358 = vst.msk [vmem:[#allocation2 + $0x4] sm:$0xf] %vm1357_vm3, %v1349_v62 }
 0x125   : > { %v1353_v32 = vpop.permute.xlu1 %1352  ;;  %v949_v56 = vpop.permute.xlu0 %948 }
 0x126   : > { %1360 = vst.msk [vmem:[#allocation2 + $0x14] sm:$0xf] %vm1357_vm3, %v1353_v32  ;;  %v1870_v0 = vld [vmem:[#allocation2] ss:$8 sps:$4 sm:$0xff]  }
 0x127   : > { %956 = vst.msk [vmem:[#allocation2 + $0x10] sm:$0xf] %vm953_vm2, %v949_v56 }
 0x129   : > { %v1872_v43 = vld [vmem:[#allocation2 + $0x4] ss:$8 sps:$4 sm:$0xff]  }
 0x12a   : > { %1762 = vmatprep.mubr.msk.bf16.mxu0 %vm1497_vm4, %v1872_v43 }
 0x12b   : > { %1541 = vmatmul.mubr.bf16.vlgmr.msra.gmra.mxu0 %v1870_v0 }
 0x12e   : > { %v1363_v60 = vld [vmem:[#allocation2 + $0x10] sm:$0xff] }
 0x12f   : > { %v1746_v19 = vcombine.low %v1363_v60, %v1363_v60  ;;  %v1747_v39 = vcombine.high %v1363_v60, %v1363_v60 }
 0x131   : > { %1763 = vmatprep.mubr.msk.bf16.mxu1 %vm1497_vm4, %v1747_v39 }
 0x132   : > { %1549 = vmatmul.mubr.bf16.vlgmr.msra.gmra.mxu1 %v1746_v19 }
 0x1eb   : > { %v1542_v47 = vpop.f32.mrf.mxu0 }
 0x1ec   : > { %v1543_v54 = vadd.f32 %v1743_v45, %v1542_v47 }
 0x1ed   : > { %v1544_v25 = vpop.f32.mrf.mxu0 }
 0x1ee   : > { %1557 = vst.msk [vmem:[%s403_s20] sm:$0xff] %vm1556_vm6, %v1543_v54 }
 0x1ef   : > { %v1545_v50 = vpop.f32.mrf.mxu0 }
 0x1f0   : > { %v1546_v51 = vadd.f32 %v1743_v45, %v1545_v50 }
 0x1f1   : > { %v1547_v10 = vpop.f32.mrf.mxu0 }
 0x1f2   : > { %v1550_v46 = vpop.f32.mrf.mxu1  ;;  %1558 = vst.msk [vmem:[%s403_s20 + $0x8] sm:$0xff] %vm1556_vm6, %v1546_v51 }
 0x1f3   : > { %v1551_v18 = vadd.f32 %v1743_v45, %v1550_v46 }
 0x1f4   : > { %v1552_v59 = vpop.f32.mrf.mxu1 }
 0x1f5   : > { %1559 = vst.msk [vmem:[%s403_s20 + $0x10] sm:$0xff] %vm1556_vm6, %v1551_v18 }
 0x1f6   : > { %v1553_v21 = vpop.f32.mrf.mxu1 }
 0x1f8   : > { %v1554_v12 = vpop.f32.mrf.mxu1 }
 0x1f9 PF: > { %s16_s25 = sadd.s32 1, %s1913_s25   ;;  %s2803_s21 = smov %s1905_s23 }
 0x1fa   : > { %p13_p10 = scmp.ge.s32.totalorder %s16_s25, 10   ;;  %s2804_s22 = smov %s1909_s24 }
 0x1fb   : > { %s2805_s23 = smov %s2808_s26  ;;  %s2806_s24 = smov %s2812_s27 }
 0x1fc   :  { %15 = sbr.rel (!%p13_p10) target bundleno = 3 (0x3), region = 83 }

</bundles_post_ra>
